<compile_context>
chip_gen: v6e
topology: v6e:2x2x1
jax: 0.10.0
libtpu: 0.0.40
codegen_flags: <defaults>
</compile_context>

<pallas_src>
import functools
import math

import numpy as np

import jax
import jax.numpy as jnp
from jax.experimental import pallas as pl
from jax.experimental.pallas import tpu as pltpu


# ---------------------------------------------------------------------------
# Kernel 1: fused blur_pool2d + per-image histogram
# ---------------------------------------------------------------------------
def _blur_hist_kernel(x_ref, awt_ref, ah_ref, o_ref, *, nbins, n_lanes):
    """One (image, channel-tile) block: blur-pool, then bin into 128 lanes.

    x_ref  : (1, c_tile, H, W)   one batch image's channel tile (x or y)
    awt_ref: (W, Wo)             width  downsample-blur matrix (transposed)
    ah_ref : (Ho, H)             height downsample-blur matrix
    o_ref  : (1, 1, n_lanes)     bin counts, accumulated across channel tiles
    """
    ct = pl.program_id(1)

    x = x_ref[0]                                   # (c_tile, H, W) f32
    c_tile, H, W = x.shape
    Wo = awt_ref.shape[1]
    Ho = ah_ref.shape[0]

    # --- separable blur + stride-2 (zero pad folded into awt/ah) -----------
    # Width pass: one big-M matmul (M = c_tile*H).
    t = jnp.dot(x.reshape(c_tile * H, W), awt_ref[...],
                preferred_element_type=jnp.float32,
                precision=jax.lax.Precision.HIGHEST)          # (c_tile*H, Wo)
    t = t.reshape(c_tile, H, Wo)
    # Height pass: batched matmul over the channel tile.
    ahb = jnp.broadcast_to(ah_ref[...][None, :, :], (c_tile, Ho, H))
    bl = jnp.einsum('coh,chw->cow', ahb, t,
                    preferred_element_type=jnp.float32,
                    precision=jax.lax.Precision.HIGHEST)      # (c_tile, Ho, Wo)

    # --- torch.histc(v, nbins, 0, 1) on the blurred tile --------------------
    # Out-of-range values are dropped; the last bin includes 1.0 exactly.
    # Single-pass binning: bins on the (padded) 128-lane axis, values moved
    # off the lane axis one static column slice at a time, per-lane partial
    # histogram accumulated with VPU adds, ONE reduction at the end.
    bl2 = bl.reshape(c_tile * Ho, Wo)
    valid = jnp.logical_and(bl2 >= 0.0, bl2 <= 1.0)
    bini = jnp.minimum(bl2 * nbins, nbins - 1).astype(jnp.int32)
    bini = jnp.where(valid, bini, -1)              # -1 matches no bin lane
    lanes = jax.lax.broadcasted_iota(jnp.int32, (1, n_lanes), 1)
    acc = jnp.zeros((c_tile * Ho, n_lanes), jnp.float32)
    # Static unroll; Wo = ceil(W/2) is small at these sizes (use a fori_loop
    # chunked variant for very wide images).
    for w in range(Wo):
        col = bini[:, w:w + 1]                     # (c_tile*Ho, 1)
        acc = acc + (col == lanes).astype(jnp.float32)
    counts = jnp.sum(acc, axis=0, keepdims=True)   # (1, n_lanes): one reduction

    @pl.when(ct == 0)
    def _():
        o_ref[...] = jnp.zeros_like(o_ref)
    o_ref[...] += counts.reshape(1, 1, n_lanes)


# ---------------------------------------------------------------------------
# Kernel 2: vectorized finalize (all (b,c) pairs at once)
# ---------------------------------------------------------------------------
def _finalize_kernel(s_ref, hx_ref, hy_ref, o_ref, *, inv_shape, eps, inv_denom):
    """loss = mean over (b,c) of cos(hist(x[b:c])/shape, hist(y[b:c])/shape).

    s_ref : (P, B)        0/1 pair-selection matrix (P = B*C pairs)
    hx_ref: (B, n_lanes)  per-image bin counts of blurred x (bins padded to 128)
    hy_ref: (B, n_lanes)  per-image bin counts of blurred y
    o_ref : (1, 1)
    Empty batch slices (b >= c) give all-zero rows whose cosine is exactly 0,
    matching torch.histc on an empty tensor + CosineSimilarity(eps).
    """
    s = s_ref[...]
    hx = hx_ref[...] * inv_shape
    hy = hy_ref[...] * inv_shape
    xs = jnp.dot(s, hx, preferred_element_type=jnp.float32,
                 precision=jax.lax.Precision.HIGHEST)          # (P, n_lanes)
    ys = jnp.dot(s, hy, preferred_element_type=jnp.float32,
                 precision=jax.lax.Precision.HIGHEST)
    dots = jnp.sum(xs * ys, axis=1, keepdims=True)             # (P, 1)
    nx = jnp.maximum(jnp.sqrt(jnp.sum(xs * xs, axis=1, keepdims=True)), eps)
    ny = jnp.maximum(jnp.sqrt(jnp.sum(ys * ys, axis=1, keepdims=True)), eps)
    cos = dots / (nx * ny)
    o_ref[...] = jnp.sum(cos, axis=0, keepdims=True) * inv_denom


# ---------------------------------------------------------------------------
# Wrappers
# ---------------------------------------------------------------------------
def _pascal_row(ksize):
    row = np.array([math.comb(ksize - 1, t) for t in range(ksize)], np.float64)
    return row / row.sum()


def _blur_pool_matrix(n, ksize, stride):
    """(n_out, n) matrix folding zero-pad + stride-`stride` binomial blur."""
    pad = (ksize - 1) // 2
    n_out = (n + 2 * pad - ksize) // stride + 1
    k = _pascal_row(ksize)
    mat = np.zeros((n_out, n), np.float32)
    for o in range(n_out):
        start = o * stride - pad
        for t in range(ksize):
            i = start + t
            if 0 <= i < n:
                mat[o, i] = k[t]
    return mat, n_out


def hist_loss(x, y, sample_rate=0.1, eps=1e-6):
    """Pallas implementation of HIST_loss.forward(x, y); returns a scalar."""
    assert x.shape == y.shape and x.ndim == 4
    B, C, H, W = x.shape
    nbins = int(256 * sample_rate)                 # 25 for sample_rate=0.1
    n_lanes = 128                                  # bins padded to a full lane width
    shape = H * W                                  # computed BEFORE the blur (as in ref)

    ah_np, Ho = _blur_pool_matrix(H, 7, 2)         # (Ho, H)
    aw_np, Wo = _blur_pool_matrix(W, 7, 2)         # (Wo, W)
    awt = jnp.asarray(aw_np.T)                     # (W, Wo)
    ah = jnp.asarray(ah_np)                        # (Ho, H)

    # Channel tile: as many channels per grid step as fit a conservative VMEM
    # budget (sized for v7x's smaller VMEM; v5e/v6e fit the same or bigger).
    bytes_per_chan = (H * W * 4) * 2 + (H * Wo * 4) + (Ho * Wo * 4) + (Ho * n_lanes * 4)
    c_tile = int(max(1, min(C, (8 << 20) // max(1, bytes_per_chan))))
    CT = pl.cdiv(C, c_tile)
    Cp = CT * c_tile

    # Stack x and y so one pallas_call handles both (halves launches, doubles
    # per-step work).  Rows 0..B-1 are x images, B..2B-1 are y images.
    xy = jnp.stack([x, y]).astype(jnp.float32).reshape(2 * B, C, H, W)
    if Cp != C:
        # Pad channels with -1.0: the blur keeps them < 0, so histc drops them.
        pad = jnp.full((2 * B, Cp - C, H, W), -1.0, jnp.float32)
        xy = jnp.concatenate([xy, pad], axis=1)

    hall = pl.pallas_call(
        functools.partial(_blur_hist_kernel, nbins=nbins, n_lanes=n_lanes),
        out_shape=jax.ShapeDtypeStruct((2 * B, 1, n_lanes), jnp.float32),
        grid=(2 * B, CT),
        in_specs=[
            pl.BlockSpec((1, c_tile, H, W), lambda g, ct: (g, ct, 0, 0)),
            pl.BlockSpec((W, Wo), lambda g, ct: (0, 0)),
            pl.BlockSpec((Ho, H), lambda g, ct: (0, 0)),
        ],
        out_specs=pl.BlockSpec((1, 1, n_lanes), lambda g, ct: (g, 0, 0)),
        compiler_params=pltpu.CompilerParams(
            dimension_semantics=("parallel", "arbitrary")),
    )(xy, awt, ah)

    hall2 = hall.reshape(2 * B, n_lanes)
    hx = hall2[:B]                                 # (B, 128) per-image counts of x
    hy = hall2[B:]                                 # (B, 128) per-image counts of y

    # Static pair-selection matrix reproducing the reference's x[b:c] batch
    # slicing: pair (b,c) sums the per-image histograms b .. min(c,B)-1.
    S_np = np.zeros((B * C, B), np.float32)
    p = 0
    for b in range(B):
        for c in range(C):
            hi = min(c, B)
            if b < hi:
                S_np[p, b:hi] = 1.0
            p += 1

    loss = pl.pallas_call(
        functools.partial(_finalize_kernel, inv_shape=1.0 / float(shape),
                          eps=float(eps), inv_denom=1.0 / float(B * C)),
        out_shape=jax.ShapeDtypeStruct((1, 1), jnp.float32),
    )(jnp.asarray(S_np), hx, hy)
    return loss[0, 0]


# ---------------------------------------------------------------------------
# Pure-JAX reference (correctness self-check of the Pallas path)
# ---------------------------------------------------------------------------
def _reference_hist_loss(x, y, sample_rate=0.1, eps=1e-6):
    B, C, H, W = x.shape
    nbins = int(256 * sample_rate)
    shape = H * W
    k1 = jnp.asarray(_pascal_row(7), jnp.float32)
    k2d = jnp.outer(k1, k1)

    def blur(im):
        w = jnp.tile(k2d[None, None], (C, 1, 1, 1))       # depthwise (C,1,7,7)
        return jax.lax.conv_general_dilated(
            im, w, window_strides=(2, 2), padding=((3, 3), (3, 3)),
            dimension_numbers=("NCHW", "OIHW", "NCHW"),
            feature_group_count=C, precision=jax.lax.Precision.HIGHEST)

    def histc(v):
        v = v.reshape(-1)
        valid = (v >= 0.0) & (v <= 1.0)
        idx = jnp.clip(jnp.floor(v * nbins).astype(jnp.int32), 0, nbins - 1)
        onehot = jax.nn.one_hot(idx, nbins, dtype=jnp.float32) * valid[:, None]
        return onehot.sum(0)

    xb, yb = blur(x), blur(y)
    total = jnp.float32(0.0)
    for b in range(B):
        for c in range(C):
            xh = histc(xb[b:c]) / shape
            yh = histc(yb[b:c]) / shape
            nx = jnp.maximum(jnp.sqrt(jnp.sum(xh * xh)), eps)
            ny = jnp.maximum(jnp.sqrt(jnp.sum(yh * yh)), eps)
            total = total + jnp.sum(xh * yh) / (nx * ny)
    return total / (B * C)


# ---------------------------------------------------------------------------
if __name__ == "__main__":
    key = jax.random.PRNGKey(0)
    kx, ky = jax.random.split(key)
    # Images in [0, 1] (the histogram range used by the reference module).
    x = jax.random.uniform(kx, (2, 4, 16, 16), jnp.float32)
    y = jax.random.uniform(ky, (2, 4, 16, 16), jnp.float32)

    loss = jax.jit(hist_loss)(x, y)
    loss = jax.block_until_ready(loss)

    assert loss.shape == ()
    assert bool(jnp.isfinite(loss))

    # Self-check against a pure-JAX reference (loose tol: a value landing on a
    # bin edge may be classified differently between the two blur paths).
    ref = _reference_hist_loss(x, y)
    np.testing.assert_allclose(np.asarray(loss), np.asarray(ref),
                               rtol=0.0, atol=2e-2)

    print("KERNEL_OK")
</pallas_src>

<mosaic_0001>
module attributes {stable_mosaic.version = 11 : i64} {
  func.func @_blur_hist_kernel(%arg0: i32, %arg1: i32, %arg2: memref<1x4x16x16xf32, #tpu.memory_space<vmem>>, %arg3: memref<16x8xf32, #tpu.memory_space<vmem>>, %arg4: memref<8x16xf32, #tpu.memory_space<vmem>>, %arg5: memref<1x1x128xf32, #tpu.memory_space<vmem>>) attributes {dimension_semantics = [#tpu.dimension_semantics<parallel>, #tpu.dimension_semantics<arbitrary>], iteration_bounds = array<i64: 4, 1>, scalar_prefetch = 0 : i64, scratch_operands = 0 : i64, tpu.core_type = #tpu.core_type<tc>, window_params = [{transform_indices = @transform_0, window_bounds = array<i64: 1, 4, 16, 16>}, {pipeline_mode = #tpu.pipeline_mode<synchronous>, transform_indices = @transform_1, window_bounds = array<i64: 16, 8>}, {pipeline_mode = #tpu.pipeline_mode<synchronous>, transform_indices = @transform_2, window_bounds = array<i64: 8, 16>}, {transform_indices = @transform_3, window_bounds = array<i64: 1, 1, 128>}]} {
    %c0 = arith.constant 0 : index
    %c0_0 = arith.constant 0 : index
    %c0_1 = arith.constant 0 : index
    %c0_2 = arith.constant 0 : index
    %0 = vector.load %arg2[%c0, %c0_0, %c0_1, %c0_2] : memref<1x4x16x16xf32, #tpu.memory_space<vmem>>, vector<1x4x16x16xf32>
    %1 = vector.shape_cast %0 : vector<1x4x16x16xf32> to vector<4x16x16xf32>
    %2 = vector.shape_cast %1 : vector<4x16x16xf32> to vector<64x16xf32>
    %c0_3 = arith.constant 0 : index
    %c0_4 = arith.constant 0 : index
    %3 = vector.load %arg3[%c0_3, %c0_4] : memref<16x8xf32, #tpu.memory_space<vmem>>, vector<16x8xf32>
    %cst = arith.constant dense<0.000000e+00> : vector<64x8xf32>
    %4 = tpu.matmul %2, %3, %cst {dimension_numbers = #tpu.dot_dimension_numbers<[1], [0], [0], [1], [0, 0, 1, 1], [], []>, precision = #tpu.contract_precision<fp32>} : vector<64x16xf32>, vector<16x8xf32>, vector<64x8xf32> -> vector<64x8xf32>
    %5 = vector.shape_cast %4 : vector<64x8xf32> to vector<4x16x8xf32>
    %c0_5 = arith.constant 0 : index
    %c0_6 = arith.constant 0 : index
    %6 = vector.load %arg4[%c0_5, %c0_6] : memref<8x16xf32, #tpu.memory_space<vmem>>, vector<8x16xf32>
    %7 = vector.shape_cast %6 : vector<8x16xf32> to vector<1x8x16xf32>
    %8 = vector.shape_cast %7 : vector<1x8x16xf32> to vector<1x8x16xf32>
    %9 = vector.broadcast %8 : vector<1x8x16xf32> to vector<4x8x16xf32>
    "tpu.trace_start"() <{level = 10 : i32, message = "coh,chw->cow"}> : () -> ()
    %cst_7 = arith.constant dense<0.000000e+00> : vector<4x8x8xf32>
    %10 = tpu.matmul %9, %5, %cst_7 {dimension_numbers = #tpu.dot_dimension_numbers<[2], [1], [1], [2], [0, 0, 0, 1, 1, 2], [0], [0]>, precision = #tpu.contract_precision<fp32>} : vector<4x8x16xf32>, vector<4x16x8xf32>, vector<4x8x8xf32> -> vector<4x8x8xf32>
    "tpu.trace_stop"() : () -> ()
    %11 = vector.shape_cast %10 : vector<4x8x8xf32> to vector<32x8xf32>
    %cst_8 = arith.constant 0.000000e+00 : f32
    %12 = vector.broadcast %cst_8 : f32 to vector<32x8xf32>
    %13 = arith.cmpf oge, %11, %12 : vector<32x8xf32>
    %cst_9 = arith.constant 1.000000e+00 : f32
    %14 = vector.broadcast %cst_9 : f32 to vector<32x8xf32>
    %15 = arith.cmpf ole, %11, %14 : vector<32x8xf32>
    %16 = arith.andi %13, %15 : vector<32x8xi1>
    %cst_10 = arith.constant 2.500000e+01 : f32
    %17 = vector.broadcast %cst_10 : f32 to vector<32x8xf32>
    %18 = arith.mulf %11, %17 : vector<32x8xf32>
    %cst_11 = arith.constant 2.400000e+01 : f32
    %19 = vector.broadcast %cst_11 : f32 to vector<32x8xf32>
    %20 = arith.minimumf %18, %19 : vector<32x8xf32>
    %21 = arith.fptosi %20 : vector<32x8xf32> to vector<32x8xi32>
    %c-1_i32 = arith.constant -1 : i32
    %22 = vector.broadcast %c-1_i32 : i32 to vector<32x8xi32>
    %23 = arith.select %16, %21, %22 : vector<32x8xi1>, vector<32x8xi32>
    %24 = tpu.iota {dimensions = array<i32: 1>} : vector<1x128xi32>
    %cst_12 = arith.constant 0.000000e+00 : f32
    %25 = vector.broadcast %cst_12 : f32 to vector<32x128xf32>
    %26 = vector.extract_strided_slice %23 {offsets = [0, 0], sizes = [32, 1], strides = [1, 1]} : vector<32x8xi32> to vector<32x1xi32>
    %27 = vector.broadcast %26 : vector<32x1xi32> to vector<32x128xi32>
    %28 = vector.broadcast %24 : vector<1x128xi32> to vector<32x128xi32>
    %29 = arith.cmpi eq, %27, %28 : vector<32x128xi32>
    %30 = arith.extui %29 : vector<32x128xi1> to vector<32x128xi32>
    %31 = arith.sitofp %30 : vector<32x128xi32> to vector<32x128xf32>
    %32 = arith.addf %25, %31 : vector<32x128xf32>
    %33 = vector.extract_strided_slice %23 {offsets = [0, 1], sizes = [32, 1], strides = [1, 1]} : vector<32x8xi32> to vector<32x1xi32>
    %34 = vector.broadcast %33 : vector<32x1xi32> to vector<32x128xi32>
    %35 = vector.broadcast %24 : vector<1x128xi32> to vector<32x128xi32>
    %36 = arith.cmpi eq, %34, %35 : vector<32x128xi32>
    %37 = arith.extui %36 : vector<32x128xi1> to vector<32x128xi32>
    %38 = arith.sitofp %37 : vector<32x128xi32> to vector<32x128xf32>
    %39 = arith.addf %32, %38 : vector<32x128xf32>
    %40 = vector.extract_strided_slice %23 {offsets = [0, 2], sizes = [32, 1], strides = [1, 1]} : vector<32x8xi32> to vector<32x1xi32>
    %41 = vector.broadcast %40 : vector<32x1xi32> to vector<32x128xi32>
    %42 = vector.broadcast %24 : vector<1x128xi32> to vector<32x128xi32>
    %43 = arith.cmpi eq, %41, %42 : vector<32x128xi32>
    %44 = arith.extui %43 : vector<32x128xi1> to vector<32x128xi32>
    %45 = arith.sitofp %44 : vector<32x128xi32> to vector<32x128xf32>
    %46 = arith.addf %39, %45 : vector<32x128xf32>
    %47 = vector.extract_strided_slice %23 {offsets = [0, 3], sizes = [32, 1], strides = [1, 1]} : vector<32x8xi32> to vector<32x1xi32>
    %48 = vector.broadcast %47 : vector<32x1xi32> to vector<32x128xi32>
    %49 = vector.broadcast %24 : vector<1x128xi32> to vector<32x128xi32>
    %50 = arith.cmpi eq, %48, %49 : vector<32x128xi32>
    %51 = arith.extui %50 : vector<32x128xi1> to vector<32x128xi32>
    %52 = arith.sitofp %51 : vector<32x128xi32> to vector<32x128xf32>
    %53 = arith.addf %46, %52 : vector<32x128xf32>
    %54 = vector.extract_strided_slice %23 {offsets = [0, 4], sizes = [32, 1], strides = [1, 1]} : vector<32x8xi32> to vector<32x1xi32>
    %55 = vector.broadcast %54 : vector<32x1xi32> to vector<32x128xi32>
    %56 = vector.broadcast %24 : vector<1x128xi32> to vector<32x128xi32>
    %57 = arith.cmpi eq, %55, %56 : vector<32x128xi32>
    %58 = arith.extui %57 : vector<32x128xi1> to vector<32x128xi32>
    %59 = arith.sitofp %58 : vector<32x128xi32> to vector<32x128xf32>
    %60 = arith.addf %53, %59 : vector<32x128xf32>
    %61 = vector.extract_strided_slice %23 {offsets = [0, 5], sizes = [32, 1], strides = [1, 1]} : vector<32x8xi32> to vector<32x1xi32>
    %62 = vector.broadcast %61 : vector<32x1xi32> to vector<32x128xi32>
    %63 = vector.broadcast %24 : vector<1x128xi32> to vector<32x128xi32>
    %64 = arith.cmpi eq, %62, %63 : vector<32x128xi32>
    %65 = arith.extui %64 : vector<32x128xi1> to vector<32x128xi32>
    %66 = arith.sitofp %65 : vector<32x128xi32> to vector<32x128xf32>
    %67 = arith.addf %60, %66 : vector<32x128xf32>
    %68 = vector.extract_strided_slice %23 {offsets = [0, 6], sizes = [32, 1], strides = [1, 1]} : vector<32x8xi32> to vector<32x1xi32>
    %69 = vector.broadcast %68 : vector<32x1xi32> to vector<32x128xi32>
    %70 = vector.broadcast %24 : vector<1x128xi32> to vector<32x128xi32>
    %71 = arith.cmpi eq, %69, %70 : vector<32x128xi32>
    %72 = arith.extui %71 : vector<32x128xi1> to vector<32x128xi32>
    %73 = arith.sitofp %72 : vector<32x128xi32> to vector<32x128xf32>
    %74 = arith.addf %67, %73 : vector<32x128xf32>
    %75 = vector.extract_strided_slice %23 {offsets = [0, 7], sizes = [32, 1], strides = [1, 1]} : vector<32x8xi32> to vector<32x1xi32>
    %76 = vector.broadcast %75 : vector<32x1xi32> to vector<32x128xi32>
    %77 = vector.broadcast %24 : vector<1x128xi32> to vector<32x128xi32>
    %78 = arith.cmpi eq, %76, %77 : vector<32x128xi32>
    %79 = arith.extui %78 : vector<32x128xi1> to vector<32x128xi32>
    %80 = arith.sitofp %79 : vector<32x128xi32> to vector<32x128xf32>
    %81 = arith.addf %74, %80 : vector<32x128xf32>
    %cst_13 = arith.constant dense<0.000000e+00> : vector<128xf32>
    %82 = vector.multi_reduction <add>, %81, %cst_13 [0] : vector<32x128xf32> to vector<128xf32>
    %83 = vector.shape_cast %82 : vector<128xf32> to vector<1x128xf32>
    %c0_i32 = arith.constant 0 : i32
    %84 = arith.cmpi eq, %arg1, %c0_i32 : i32
    %85 = arith.extui %84 : i1 to i32
    %c0_i32_14 = arith.constant 0 : i32
    %86 = arith.cmpi ne, %85, %c0_i32_14 : i32
    scf.if %86 {
      %cst_21 = arith.constant 0.000000e+00 : f32
      %91 = vector.broadcast %cst_21 : f32 to vector<1x1x128xf32>
      %c0_22 = arith.constant 0 : index
      %c0_23 = arith.constant 0 : index
      %c0_24 = arith.constant 0 : index
      %92 = vector.load %arg5[%c0_22, %c0_23, %c0_24] : memref<1x1x128xf32, #tpu.memory_space<vmem>>, vector<1x1x128xf32>
      tpu.vector_store %arg5[%c0_22, %c0_23, %c0_24], %91 {strides = array<i32>} : memref<1x1x128xf32, #tpu.memory_space<vmem>>, vector<1x1x128xf32>,
    } else {
    }
    %c0_15 = arith.constant 0 : index
    %c0_16 = arith.constant 0 : index
    %c0_17 = arith.constant 0 : index
    %87 = vector.load %arg5[%c0_15, %c0_16, %c0_17] : memref<1x1x128xf32, #tpu.memory_space<vmem>>, vector<1x1x128xf32>
    %88 = vector.shape_cast %83 : vector<1x128xf32> to vector<1x1x128xf32>
    %89 = arith.addf %87, %88 : vector<1x1x128xf32>
    %c0_18 = arith.constant 0 : index
    %c0_19 = arith.constant 0 : index
    %c0_20 = arith.constant 0 : index
    %90 = vector.load %arg5[%c0_18, %c0_19, %c0_20] : memref<1x1x128xf32, #tpu.memory_space<vmem>>, vector<1x1x128xf32>
    tpu.vector_store %arg5[%c0_18, %c0_19, %c0_20], %89 {strides = array<i32>} : memref<1x1x128xf32, #tpu.memory_space<vmem>>, vector<1x1x128xf32>,
    return
  }
  func.func @transform_0(%arg0: i32, %arg1: i32) -> (i32, i32, i32, i32) {
    %c0_i32 = arith.constant 0 : i32
    %c0_i32_0 = arith.constant 0 : i32
    %c0_i32_1 = arith.constant 0 : i32
    return %arg0, %arg1, %c0_i32, %c0_i32_0 : i32, i32, i32, i32
  }
  func.func @transform_1(%arg0: i32, %arg1: i32) -> (i32, i32) {
    %c0_i32 = arith.constant 0 : i32
    %c0_i32_0 = arith.constant 0 : i32
    %c0_i32_1 = arith.constant 0 : i32
    return %c0_i32, %c0_i32_0 : i32, i32
  }
  func.func @transform_2(%arg0: i32, %arg1: i32) -> (i32, i32) {
    %c0_i32 = arith.constant 0 : i32
    %c0_i32_0 = arith.constant 0 : i32
    %c0_i32_1 = arith.constant 0 : i32
    return %c0_i32, %c0_i32_0 : i32, i32
  }
  func.func @transform_3(%arg0: i32, %arg1: i32) -> (i32, i32, i32) {
    %c0_i32 = arith.constant 0 : i32
    %c0_i32_0 = arith.constant 0 : i32
    %c0_i32_1 = arith.constant 0 : i32
    return %arg0, %c0_i32, %c0_i32_0 : i32, i32, i32
  }
}

module attributes {stable_mosaic.version = 11 : i64} {
  func.func @_finalize_kernel(%arg0: memref<8x2xf32, #tpu.memory_space<vmem>>, %arg1: memref<2x128xf32, #tpu.memory_space<vmem>>, %arg2: memref<2x128xf32, #tpu.memory_space<vmem>>, %arg3: memref<1x1xf32, #tpu.memory_space<vmem>>) attributes {dimension_semantics = [], scalar_prefetch = 0 : i64, scratch_operands = 0 : i64, tpu.core_type = #tpu.core_type<tc>} {
    %c0 = arith.constant 0 : index
    %c0_0 = arith.constant 0 : index
    %0 = vector.load %arg0[%c0, %c0_0] : memref<8x2xf32, #tpu.memory_space<vmem>>, vector<8x2xf32>
    %c0_1 = arith.constant 0 : index
    %c0_2 = arith.constant 0 : index
    %1 = vector.load %arg1[%c0_1, %c0_2] : memref<2x128xf32, #tpu.memory_space<vmem>>, vector<2x128xf32>
    %cst = arith.constant 3.906250e-03 : f32
    %2 = vector.broadcast %cst : f32 to vector<2x128xf32>
    %3 = arith.mulf %1, %2 : vector<2x128xf32>
    %c0_3 = arith.constant 0 : index
    %c0_4 = arith.constant 0 : index
    %4 = vector.load %arg2[%c0_3, %c0_4] : memref<2x128xf32, #tpu.memory_space<vmem>>, vector<2x128xf32>
    %cst_5 = arith.constant 3.906250e-03 : f32
    %5 = vector.broadcast %cst_5 : f32 to vector<2x128xf32>
    %6 = arith.mulf %4, %5 : vector<2x128xf32>
    %cst_6 = arith.constant dense<0.000000e+00> : vector<8x128xf32>
    %7 = tpu.matmul %0, %3, %cst_6 {dimension_numbers = #tpu.dot_dimension_numbers<[1], [0], [0], [1], [0, 0, 1, 1], [], []>, precision = #tpu.contract_precision<fp32>} : vector<8x2xf32>, vector<2x128xf32>, vector<8x128xf32> -> vector<8x128xf32>
    %cst_7 = arith.constant dense<0.000000e+00> : vector<8x128xf32>
    %8 = tpu.matmul %0, %6, %cst_7 {dimension_numbers = #tpu.dot_dimension_numbers<[1], [0], [0], [1], [0, 0, 1, 1], [], []>, precision = #tpu.contract_precision<fp32>} : vector<8x2xf32>, vector<2x128xf32>, vector<8x128xf32> -> vector<8x128xf32>
    %9 = arith.mulf %7, %8 : vector<8x128xf32>
    %cst_8 = arith.constant dense<0.000000e+00> : vector<8xf32>
    %10 = vector.multi_reduction <add>, %9, %cst_8 [1] : vector<8x128xf32> to vector<8xf32>
    %11 = vector.shape_cast %10 : vector<8xf32> to vector<8x1xf32>
    %12 = arith.mulf %7, %7 : vector<8x128xf32>
    %cst_9 = arith.constant dense<0.000000e+00> : vector<8xf32>
    %13 = vector.multi_reduction <add>, %12, %cst_9 [1] : vector<8x128xf32> to vector<8xf32>
    %14 = vector.shape_cast %13 : vector<8xf32> to vector<8x1xf32>
    %15 = math.sqrt %14 : vector<8x1xf32>
    %cst_10 = arith.constant 9.99999997E-7 : f32
    %16 = vector.broadcast %cst_10 : f32 to vector<8x1xf32>
    %17 = arith.maximumf %15, %16 : vector<8x1xf32>
    %18 = arith.mulf %8, %8 : vector<8x128xf32>
    %cst_11 = arith.constant dense<0.000000e+00> : vector<8xf32>
    %19 = vector.multi_reduction <add>, %18, %cst_11 [1] : vector<8x128xf32> to vector<8xf32>
    %20 = vector.shape_cast %19 : vector<8xf32> to vector<8x1xf32>
    %21 = math.sqrt %20 : vector<8x1xf32>
    %cst_12 = arith.constant 9.99999997E-7 : f32
    %22 = vector.broadcast %cst_12 : f32 to vector<8x1xf32>
    %23 = arith.maximumf %21, %22 : vector<8x1xf32>
    %24 = arith.mulf %17, %23 : vector<8x1xf32>
    %25 = arith.divf %11, %24 : vector<8x1xf32>
    %cst_13 = arith.constant dense<0.000000e+00> : vector<1xf32>
    %26 = vector.multi_reduction <add>, %25, %cst_13 [0] : vector<8x1xf32> to vector<1xf32>
    %27 = vector.shape_cast %26 : vector<1xf32> to vector<1x1xf32>
    %cst_14 = arith.constant 1.250000e-01 : f32
    %28 = vector.broadcast %cst_14 : f32 to vector<1x1xf32>
    %29 = arith.mulf %27, %28 : vector<1x1xf32>
    %c0_15 = arith.constant 0 : index
    %c0_16 = arith.constant 0 : index
    %30 = vector.load %arg3[%c0_15, %c0_16] : memref<1x1xf32, #tpu.memory_space<vmem>>, vector<1x1xf32>
    tpu.vector_store %arg3[%c0_15, %c0_16], %29 {strides = array<i32>} : memref<1x1xf32, #tpu.memory_space<vmem>>, vector<1x1xf32>,
    return
  }
}

</mosaic_0001>

<bundles_post_ra>
// kernel: hist_loss.3
= control target key start
LH: loop header
LB: loop body
LE: loop exit
PB: predicated region body
PF: predicated region fallthrough
CT: control target
= control target key end

     0   :  { %vm24_vm0 = vcmask 1041408   ;;  %v1089_v2 = vmov 0.0   ;;  %vm1090_vm1 = vmmov 0   ;;  %vm20_vm2 = vcmask 15360   ;;  %s1162_s0 = inlined_call_operand.vmem [shape: f32[8,2], index: 0, kind: input, shape index: {}]   ;;  %s1163_s1 = inlined_call_operand.vmem [shape: f32[2,128], index: 1, kind: input, shape index: {}]   ;;  %s1164_s2 = inlined_call_operand.vmem [shape: f32[2,128], index: 2, kind: input, shape index: {}]   ;;  %s1165_s3 = inlined_call_operand.hbm [shape: f32[1,1], index: 3, kind: output, shape index: {}]  }
   0x1   :  { %v16_v0 = vld [vmem:[%s1163_s1] sm:$0x3]  ;;  %998 = vmatprep.subr.mxu0 %v1089_v2  ;;  %1000 = vmatprep.mubr.msk.f32.mxu0 %vm1090_vm1, %v1089_v2 }
   0x2   :  { %v15_v1 = vld [vmem:[%s1162_s0] sm:$0xff]  ;;  %v17_v3 = vmul.f32 0.00390625, %v16_v0 }
   0x3   :  { %v18_v4 = vld [vmem:[%s1164_s2] sm:$0x3] }
   0x4   :  { %8 = vsyncpa [#allocation3], 0  ;;  %v22_v5 = vsel %vm20_vm2, %v15_v1, 0  ;;  %1003 = vmatprep.subr.mxu1 %v1089_v2  ;;  %1005 = vmatprep.mubr.msk.f32.mxu1 %vm1090_vm1, %v1089_v2  ;;  %v19_v6 = vmul.f32 0.00390625, %v18_v4  ;;  %v26_v7 = vsel %vm24_vm0, %v17_v3, 0  ;;  %s1091_s0 = smov [#allocation2]  }
   0x5   :  { %v94_v8 = vand.u32 4294901760, %v22_v5  ;;  %v59_v9 = vand.u32 4294901760, %v26_v7  ;;  %s966_s1 = sshll.u32 %s1091_s0, 4  ;;  %vm958_vm7 = vcmask 0   ;;  %s967_s1 = int_to_ptr.vmem [resolvable:$true] %s966_s1 }
   0x6   :  { %v475_v10 = vsel %vm24_vm0, %v19_v6, 0  ;;  %s1067_s2 = scalar_lea.vmem %s967_s1, 16  ;;  %s1071_s18 = scalar_lea.vmem %s967_s1, 32 }
   0x7   :  { %v95_v11 = vsub.f32 %v22_v5, %v94_v8  ;;  %v508_v12 = vand.u32 4294901760, %v475_v10  ;;  %999 = vmatpush3.msra.mxu0 %v59_v9  ;;  %v136_v13 = vsub.f32 %v26_v7, %v59_v9  ;;  %p1068_p0 = scmp.ne.s32.totalorder %s967_s1, %s1067_s2  ;;  %p1072_p1 = scmp.lt.s32.totalorder %s967_s1, %s967_s1 }
   0x8   :  { %1008 = vmatprep.subr.mxu0 %v1089_v2  ;;  %p1073_p2 = scmp.lt.s32.totalorder %s1071_s18, %s1067_s2 }
   0x9   :  { %v96_v14 = vand.u32 4294901760, %v95_v11  ;;  %v137_v15 = vand.u32 4294901760, %v136_v13  ;;  %v585_v17 = vsub.f32 %v475_v10, %v508_v12 }
   0xa   :  { %p1074_p3 = por %p1073_p2, %p1072_p1 }
   0xb   :  { %v97_v16 = vsub.f32 %v95_v11, %v96_v14  ;;  %v138_v18 = vsub.f32 %v136_v13, %v137_v15  ;;  %v586_v21 = vand.u32 4294901760, %v585_v17 }
   0xc   :  { %p1075_p4 = pnand %p1074_p3, %p1068_p0 }
   0xd   :  { %v98_v19 = vand.u32 4294901760, %v97_v16  ;;  %v139_v20 = vand.u32 4294901760, %v138_v18  ;;  %v587_v22 = vsub.f32 %v585_v17, %v586_v21 }
   0xf   :  { %1001 = vmatmul.mubr.f32.vlgmr.msra.gmra.mxu0 %v98_v19  ;;  %1004 = vmatpush3.msra.mxu1 %v139_v20  ;;  %v588_v23 = vand.u32 4294901760, %v587_v22 }
  0x10   :  { %1009 = vmatpush3.msra.mxu0 %v136_v13  ;;  %1006 = vmatmul.mubr.f32.vlgmr.msra.gmra.mxu1 %v94_v8 }
  0x11   :  { %1010 = vmatprep.mubr.msk.f32.mxu0 %vm1090_vm1, %v1089_v2  ;;  %1013 = vmatprep.subr.mxu1 %v1089_v2 }
  0x12   :  { %1018 = vmatprep.subr.mxu0 %v1089_v2  ;;  %1014 = vmatpush3.msra.mxu1 %v59_v9 }
  0x13   :  { %1011 = vmatmul.mubr.f32.vlgmr.msra.gmra.mxu0 %v95_v11  ;;  %1015 = vmatprep.mubr.msk.f32.mxu1 %vm1090_vm1, %v1089_v2 }
  0x14   :  { %1019 = vmatpush3.msra.mxu0 %v137_v15  ;;  %1016 = vmatmul.mubr.f32.vlgmr.msra.gmra.mxu1 %v96_v14 }
  0x15   :  { %1020 = vmatprep.mubr.msk.f32.mxu0 %vm1090_vm1, %v1089_v2  ;;  %1023 = vmatprep.subr.mxu1 %v1089_v2 }
  0x16   :  { %1028 = vmatprep.subr.mxu0 %v1089_v2  ;;  %1024 = vmatpush3.msra.mxu1 %v59_v9 }
  0x17   :  { %1021 = vmatmul.mubr.f32.vlgmr.msra.gmra.mxu0 %v94_v8  ;;  %1025 = vmatprep.mubr.msk.f32.mxu1 %vm1090_vm1, %v1089_v2 }
  0x18   :  { %1029 = vmatpush3.msra.mxu0 %v508_v12  ;;  %1026 = vmatmul.mubr.f32.vlgmr.msra.gmra.mxu1 %v94_v8 }
  0x19   :  { %1030 = vmatprep.mubr.msk.f32.mxu0 %vm1090_vm1, %v1089_v2  ;;  %1033 = vmatprep.subr.mxu1 %v1089_v2 }
  0x1a   :  { %1038 = vmatprep.subr.mxu0 %v1089_v2  ;;  %1034 = vmatpush3.msra.mxu1 %v588_v23 }
  0x1b   :  { %1031 = vmatmul.mubr.f32.vlgmr.msra.gmra.mxu0 %v98_v19  ;;  %1035 = vmatprep.mubr.msk.f32.mxu1 %vm1090_vm1, %v1089_v2 }
  0x1c   :  { %1039 = vmatpush3.msra.mxu0 %v585_v17  ;;  %1036 = vmatmul.mubr.f32.vlgmr.msra.gmra.mxu1 %v94_v8 }
  0x1d   :  { %1040 = vmatprep.mubr.msk.f32.mxu0 %vm1090_vm1, %v1089_v2  ;;  %1043 = vmatprep.subr.mxu1 %v1089_v2 }
  0x1e   :  { %1048 = vmatprep.subr.mxu0 %v1089_v2  ;;  %1044 = vmatpush3.msra.mxu1 %v508_v12 }
  0x1f   :  { %1041 = vmatmul.mubr.f32.vlgmr.msra.gmra.mxu0 %v95_v11  ;;  %1045 = vmatprep.mubr.msk.f32.mxu1 %vm1090_vm1, %v1089_v2 }
  0x20   :  { %1049 = vmatpush3.msra.mxu0 %v586_v21  ;;  %1046 = vmatmul.mubr.f32.vlgmr.msra.gmra.mxu1 %v96_v14 }
  0x21   :  { %1050 = vmatprep.mubr.msk.f32.mxu0 %vm1090_vm1, %v1089_v2  ;;  %1053 = vmatprep.subr.mxu1 %v1089_v2 }
  0x22   :  { %1055 = vmatprep.mubr.msk.f32.mxu1 %vm1090_vm1, %v1089_v2  ;;  %1054 = vmatpush3.msra.mxu1 %v508_v12 }
  0x23   :  { %1051 = vmatmul.mubr.f32.vlgmr.msra.gmra.mxu0 %v94_v8 }
  0x24   :  { %1056 = vmatmul.mubr.f32.vlgmr.msra.gmra.mxu1 %v94_v8 }
  0xcf   :  { %v100_v24 = vpop.f32.mrf.mxu0 }
  0xd0   :  { %v176_v26 = vpop.f32.mrf.mxu1 }
  0xd1   :  { %v1002_v25 = vpop.f32.mrf.mxu0  ;;  %v177_v27 = vadd.f32 %v176_v26, %v100_v24 }
  0xd2   :  { %v1007_v29 = vpop.f32.mrf.mxu1 }
  0xd3   :  { %v250_v28 = vpop.f32.mrf.mxu0 }
  0xd4   :  { %v251_v30 = vadd.f32 %v250_v28, %v177_v27  ;;  %v324_v32 = vpop.f32.mrf.mxu1 }
  0xd5   :  { %v1012_v31 = vpop.f32.mrf.mxu0 }
  0xd6   :  { %v325_v33 = vadd.f32 %v324_v32, %v251_v30  ;;  %v1017_v35 = vpop.f32.mrf.mxu1 }
  0xd7   :  { %v398_v34 = vpop.f32.mrf.mxu0 }
  0xd8   :  { %v399_v36 = vadd.f32 %v398_v34, %v325_v33  ;;  %v470_v38 = vpop.f32.mrf.mxu1 }
  0xd9   :  { %v1022_v37 = vpop.f32.mrf.mxu0 }
  0xda   :  { %v471_v39 = vadd.f32 %v470_v38, %v399_v36  ;;  %v1027_v41 = vpop.f32.mrf.mxu1 }
  0xdb   :  { %v549_v40 = vpop.f32.mrf.mxu0 }
  0xdc   :  { %v926_v42 = vmul.f32 %v471_v39, %v471_v39  ;;  %v625_v44 = vpop.f32.mrf.mxu1 }
  0xdd   :  { %v1032_v43 = vpop.f32.mrf.mxu0  ;;  %v626_v45 = vadd.f32 %v625_v44, %v549_v40 }
  0xde   :  { %927 = vadd.xlane.f32.xlu0 %v926_v42  ;;  %v1037_v47 = vpop.f32.mrf.mxu1 }
  0xdf   :  { %v699_v46 = vpop.f32.mrf.mxu0 }
  0xe0   :  { %v700_v48 = vadd.f32 %v699_v46, %v626_v45  ;;  %v773_v50 = vpop.f32.mrf.mxu1 }
  0xe1   :  { %v1042_v49 = vpop.f32.mrf.mxu0 }
  0xe2   :  { %v774_v51 = vadd.f32 %v773_v50, %v700_v48  ;;  %v1047_v53 = vpop.f32.mrf.mxu1 }
  0xe3   :  { %v847_v52 = vpop.f32.mrf.mxu0 }
  0xe4   :  { %v848_v54 = vadd.f32 %v847_v52, %v774_v51  ;;  %v919_v56 = vpop.f32.mrf.mxu1 }
  0xe5   :  { %v1052_v55 = vpop.f32.mrf.mxu0 }
  0xe6   :  { %v920_v57 = vadd.f32 %v919_v56, %v848_v54  ;;  %v1057_v58 = vpop.f32.mrf.mxu1 }
  0xe8   :  { %v937_v59 = vmul.f32 %v920_v57, %v920_v57  ;;  %v923_v60 = vmul.f32 %v920_v57, %v471_v39 }
  0xea   :  { %938 = vadd.xlane.f32.xlu0 %v937_v59  ;;  %924 = vadd.xlane.f32.xlu1 %v923_v60 }
 0x167   :  { %v928_v61 = vpop.xlane.xlu0 %927 }
 0x168   :  { %1061 = vrsqrt.f32 %v928_v61  ;;  %vm931_vm3 = vcmp.eq.f32.partialorder %v928_v61, inf  ;;  %v934_v3 = vand.u32 2147483648, %v928_v61  ;;  %vm933_vm4 = vcmp.eq.f32.partialorder %v928_v61, 0.0 }
 0x173   :  { %v939_v62 = vpop.xlane.xlu0 %938  ;;  %v925_v13 = vpop.xlane.xlu1 %924 }
 0x174   :  { %1063 = vrsqrt.f32 %v939_v62  ;;  %vm942_vm5 = vcmp.eq.f32.partialorder %v939_v62, inf  ;;  %v945_v6 = vand.u32 2147483648, %v939_v62  ;;  %vm944_vm6 = vcmp.eq.f32.partialorder %v939_v62, 0.0 }
 0x175   :  { %v1062_v63 = vpop.eup %1061 }
 0x176   :  { %v930_v0 = vmul.f32 %v1062_v63, %v928_v61 }
 0x178   :  { %v932_v1 = vsel %vm931_vm3, %v928_v61, %v930_v0 }
 0x179   :  { %v935_v5 = vsel %vm933_vm4, %v934_v3, %v932_v1 }
 0x17a   :  { %v936_v9 = vmax.f32 %v935_v5, 1e-06 }
 0x181   :  { %v1064_v2 = vpop.eup %1063 }
 0x182   :  { %v941_v4 = vmul.f32 %v1064_v2, %v939_v62 }
 0x184   :  { %v943_v7 = vsel %vm942_vm5, %v939_v62, %v941_v4 }
 0x185   :  { %v946_v8 = vsel %vm944_vm6, %v945_v6, %v943_v7 }
 0x186   :  { %v947_v10 = vmax.f32 %v946_v8, 1e-06 }
 0x188   :  { %v948_v11 = vmul.f32 %v947_v10, %v936_v9 }
 0x18a   :  { %1065 = vrcp.f32 %v948_v11 }
 0x197   :  { %v1066_v12 = vpop.eup %1065 }
 0x198   :  { %v950_v14 = vmul.f32 %v1066_v12, %v925_v13 }
 0x19a   :  { %v951_v15 = vrot.slane %v950_v14, 4 }
 0x19c   :  { %v952_v16 = vadd.f32 %v951_v15, %v950_v14 }
 0x19e   :  { %v953_v17 = vrot.slane %v952_v16, 2 }
 0x1a0   :  { %v954_v18 = vadd.f32 %v953_v17, %v952_v16 }
 0x1a2   :  { %v955_v19 = vrot.slane %v954_v18, 1 }
 0x1a4   :  { %v956_v20 = vadd.f32 %v955_v19, %v954_v18 }
 0x1a6   :  { %v957_v21 = vmul.f32 0.125, %v956_v20 }
 0x1a8   :  { %959 = vst.msk [vmem:[#allocation2] sm:$0x1] %vm958_vm7, %v957_v21 }
 0x1a9   :  { %1078 = shalt.err (!%p1075_p4)
}
 0x1aa   :  { %969 = dma.vmem_to_hbm [thread:$0]  %s967_s1, 16, %s1165_s3, [#allocation3]  }
 0x1ab   :  { %1087 = dma.done.wait [#allocation3], 16  }
 0x1ac   :  { %1088 = vsyncadd [#allocation3], 4294967280 }
 0x1ad   :  { %973 = vsyncpa [#allocation3], 1 }

// kernel: hist_loss.2
= control target key start
LH: loop header
LB: loop body
LE: loop exit
PB: predicated region body
PF: predicated region fallthrough
CT: control target
= control target key end

     0   :  { %s3733_s12 = smov 0   ;;  %s3735_s13 = smov 0   ;;  %s4259_s0 = inlined_call_operand.vmem [shape: f32[4,4,16,16], index: 0, kind: input, shape index: {}]   ;;  %s4260_s1 = inlined_call_operand.vmem [shape: f32[16,8], index: 1, kind: input, shape index: {}]   ;;  %s4261_s2 = inlined_call_operand.vmem [shape: f32[8,16], index: 2, kind: input, shape index: {}]   ;;  %s4262_s3 = inlined_call_operand.vmem [shape: f32[4,1,128], index: 3, kind: output, shape index: {}]  }
   0x1   :  { %s3737_s14 = smov 0  }
   0x2 LB: > { %s25_s15 = sadd.s32 1, %s3697_s13  ;;  %p3172_p0 = scmp.ge.s32.totalorder %s3701_s14, 1  ;;  %s3701_s14 = sphi %s3737_s14, %s13_s14   ;;  %s3697_s13 = sphi %s3735_s13, %s4264_s13   ;;  %s3693_s12 = sphi %s3733_s12, %s4263_s12  }
   0x3   : > { %p27_p1 = scmp.ge.s32.totalorder %s25_s15, 4  ;;  %p157_p2 = scmp.lt.s32.totalorder %s3701_s14, 5 }
   0x5   : > { %s4266_s15 = smov (%p27_p1, %s25_s15), 0  ;;  %p158_p3 = pnand %p3172_p0, %p157_p2 }
   0x6   : > { %p185_p4 = scmp.lt.s32.totalorder (!%p158_p3), %s3693_s12, 3 }
   0x7   : > { %161 = sbr.rel (%p158_p3) target bundleno = 727 (0x2d7), region = 32 }
   0xc   : > { %v207_v0 = vld [vmem:[%s4260_s1 + $0x8] sm:$0xff]  ;;  %v206_v1 = vld [vmem:[%s4260_s1] sm:$0xff]  ;;  %s4268_s12 = smov (!%p185_p4, %s3693_s12), 3  ;;  %vm208_vm0 = vcmask 130048   ;;  %vm3704_vm1 = vmmov 0  }
   0xd   : > { %v3757_v2 = vand.u32 4294901760, %v207_v0  ;;  %v3759_v3 = vand.u32 4294901760, %v206_v1  ;;  %s3209_s20 = sshll.u32 %s4268_s12, 6  ;;  %s4159_s28 = scalar_lea.vmem %s4262_s3, %s4268_s12 }
   0xe   : > { %s193_s23 = scalar_lea.vmem %s4259_s0, %s3209_s20 }
   0xf   : > { %3342 = vmatprep.subr.mxu0 %v3757_v2  ;;  %v3765_v4 = vsub.f32 %v207_v0, %v3757_v2  ;;  %v3768_v5 = vsub.f32 %v206_v1, %v3759_v3  ;;  %v198_v8 = vld [vmem:[%s193_s23] sm:$0xff]  ;;  %v199_v9 = vld [vmem:[%s193_s23 + $0x8] sm:$0xff]  ;;  %v200_v10 = vld [vmem:[%s193_s23 + $0x10] sm:$0xff] }
  0x10   : > { %3343 = vmatpush3.msra.mxu0 %v3757_v2  ;;  %v210_v13 = vsel %vm208_vm0, %v198_v8, 0  ;;  %v213_v14 = vsel %vm208_vm0, %v199_v9, 0  ;;  %v201_v15 = vld [vmem:[%s193_s23 + $0x18] sm:$0xff]  ;;  %v202_v16 = vld [vmem:[%s193_s23 + $0x20] sm:$0xff]  ;;  %v203_v17 = vld [vmem:[%s193_s23 + $0x28] sm:$0xff]  ;;  %v216_v20 = vsel %vm208_vm0, %v200_v10, 0 }
  0x11   : > { %v3773_v6 = vand.u32 4294901760, %v3765_v4  ;;  %3344 = vmatprep.subr.mxu0 %v3759_v3  ;;  %v3777_v7 = vand.u32 4294901760, %v3768_v5  ;;  %v3790_v18 = vand.u32 4294901760, %v210_v13  ;;  %v3792_v19 = vand.u32 4294901760, %v213_v14  ;;  %v204_v26 = vld [vmem:[%s193_s23 + $0x30] sm:$0xff]  ;;  %v205_v27 = vld [vmem:[%s193_s23 + $0x38] sm:$0xff] }
  0x12   : > { %3345 = vmatpush3.msra.mxu0 %v3759_v3  ;;  %v219_v21 = vsel %vm208_vm0, %v201_v15, 0  ;;  %v3796_v24 = vand.u32 4294901760, %v216_v20  ;;  %v222_v30 = vsel %vm208_vm0, %v202_v16, 0  ;;  %v225_v31 = vsel %vm208_vm0, %v203_v17, 0 }
  0x13   : > { %v412_v11 = vsub.f32 %v3765_v4, %v3773_v6  ;;  %v419_v12 = vsub.f32 %v3768_v5, %v3777_v7  ;;  %3374 = vmatprep.subr.mxu0 %v3765_v4  ;;  %v3798_v25 = vand.u32 4294901760, %v219_v21  ;;  %v3801_v28 = vsub.f32 %v210_v13, %v3790_v18  ;;  %3362 = vmatprep.mubr.f32.mxu1 %v3790_v18 }
  0x14   : > { %v3805_v29 = vsub.f32 %v213_v14, %v3792_v19  ;;  %v3810_v32 = vsub.f32 %v216_v20, %v3796_v24  ;;  %v3815_v34 = vand.u32 4294901760, %v222_v30  ;;  %v3817_v35 = vand.u32 4294901760, %v225_v31 }
  0x15   : > { %v413_v22 = vand.u32 4294901760, %v412_v11  ;;  %v420_v23 = vand.u32 4294901760, %v419_v12  ;;  %v3813_v33 = vsub.f32 %v219_v21, %v3798_v25  ;;  %v302_v36 = vand.u32 4294901760, %v3801_v28 }
  0x16   : > { %v312_v37 = vand.u32 4294901760, %v3805_v29  ;;  %v228_v38 = vsel %vm208_vm0, %v204_v26, 0  ;;  %v231_v39 = vsel %vm208_vm0, %v205_v27, 0  ;;  %v322_v40 = vand.u32 4294901760, %v3810_v32 }
  0x17   : > { %3358 = vmatprep.subr.mxu1 %v413_v22  ;;  %v332_v41 = vand.u32 4294901760, %v3813_v33  ;;  %v3826_v42 = vsub.f32 %v222_v30, %v3815_v34  ;;  %v3829_v43 = vsub.f32 %v225_v31, %v3817_v35  ;;  %v303_v44 = vsub.f32 %v3801_v28, %v302_v36 }
  0x18   : > { %3359 = vmatpush3.msra.mxu1 %v413_v22  ;;  %v313_v45 = vsub.f32 %v3805_v29, %v312_v37  ;;  %v3833_v46 = vand.u32 4294901760, %v228_v38  ;;  %v3835_v47 = vand.u32 4294901760, %v231_v39  ;;  %v323_v48 = vsub.f32 %v3810_v32, %v322_v40 }
  0x19   : > { %3360 = vmatprep.subr.mxu1 %v420_v23  ;;  %v333_v49 = vsub.f32 %v3813_v33, %v332_v41  ;;  %v342_v50 = vand.u32 4294901760, %v3826_v42  ;;  %v352_v51 = vand.u32 4294901760, %v3829_v43  ;;  %v304_v52 = vand.u32 4294901760, %v303_v44 }
  0x1a   : > { %3361 = vmatpush3.msra.mxu1 %v420_v23  ;;  %v314_v53 = vand.u32 4294901760, %v313_v45  ;;  %v361_v54 = vsub.f32 %v228_v38, %v3833_v46  ;;  %v371_v55 = vsub.f32 %v231_v39, %v3835_v47  ;;  %v324_v56 = vand.u32 4294901760, %v323_v48 }
  0x1b   : > { %3363 = vmatmul.mubr.f32.vlgmr.msra.gmra.mxu1 %v3792_v19  ;;  %3390 = vmatprep.subr.mxu1 %v3757_v2  ;;  %v343_v57 = vsub.f32 %v3826_v42, %v342_v50  ;;  %v334_v59 = vand.u32 4294901760, %v333_v49  ;;  %v353_v60 = vsub.f32 %v3829_v43, %v352_v51 }
  0x1c   : > { %3365 = vmatprep.mubr.f32.mxu1 %v3796_v24  ;;  %3391 = vmatpush3.msra.mxu1 %v3757_v2  ;;  %v362_v58 = vand.u32 4294901760, %v361_v54  ;;  %v372_v61 = vand.u32 4294901760, %v371_v55 }
  0x1d   : > { %3392 = vmatprep.subr.mxu1 %v3759_v3  ;;  %3346 = vmatprep.mubr.f32.mxu0 %v304_v52  ;;  %v344_v62 = vand.u32 4294901760, %v343_v57  ;;  %v354_v0 = vand.u32 4294901760, %v353_v60 }
  0x1e   : > { %3393 = vmatpush3.msra.mxu1 %v3759_v3  ;;  %3347 = vmatmul.mubr.f32.vlgmr.msra.gmra.mxu0 %v314_v53  ;;  %v363_v63 = vsub.f32 %v361_v54, %v362_v58  ;;  %v373_v1 = vsub.f32 %v371_v55, %v372_v61 }
  0x1f   : > { %3366 = vmatmul.mubr.f32.gmra.mxu1 %v3798_v25  ;;  %3349 = vmatprep.mubr.f32.mxu0 %v324_v56 }
  0x20   : > { %3368 = vmatprep.mubr.f32.mxu1 %v3815_v34  ;;  %3375 = vmatpush3.msra.mxu0 %v3765_v4  ;;  %v364_v8 = vand.u32 4294901760, %v363_v63  ;;  %v374_v9 = vand.u32 4294901760, %v373_v1 }
  0x21   : > { %3422 = vmatprep.subr.mxu1 %v3757_v2  ;;  %3376 = vmatprep.subr.mxu0 %v3768_v5 }
  0x22   : > { %3350 = vmatmul.mubr.f32.gmra.mxu0 %v334_v59 }
  0x23   : > { %3369 = vmatmul.mubr.f32.gmra.mxu1 %v3817_v35  ;;  %3352 = vmatprep.mubr.f32.mxu0 %v344_v62 }
  0x24   : > { %3371 = vmatprep.mubr.f32.mxu1 %v3833_v46  ;;  %3377 = vmatpush3.msra.mxu0 %v3768_v5 }
  0x25   : > { %3406 = vmatprep.subr.mxu0 %v3773_v6 }
  0x26   : > { %3353 = vmatmul.mubr.f32.gmra.mxu0 %v354_v0 }
  0x27   : > { %3372 = vmatmul.mubr.f32.gmra.mxu1 %v3835_v47  ;;  %3355 = vmatprep.mubr.f32.mxu0 %v364_v8 }
  0x28   : > { %3394 = vmatprep.mubr.f32.mxu1 %v302_v36 }
  0x2a   : > { %3356 = vmatmul.mubr.f32.gmra.mxu0 %v374_v9 }
  0x2b   : > { %3395 = vmatmul.mubr.f32.vlgmr.msra.gmra.mxu1 %v312_v37  ;;  %3378 = vmatprep.mubr.f32.mxu0 %v3801_v28 }
  0x2c   : > { %3397 = vmatprep.mubr.f32.mxu1 %v322_v40  ;;  %3423 = vmatpush3.msra.mxu1 %v3757_v2  ;;  %v3703_v2 = vmov 0.0  }
  0x2d   : > { %3424 = vmatprep.subr.mxu1 %v3759_v3  ;;  %3100 = vst [vmem:[%s4159_s28] sm:$0x1] %v3703_v2 }
  0x2e   : > { %3379 = vmatmul.mubr.f32.vlgmr.msra.gmra.mxu0 %v3805_v29  ;;  %3425 = vmatpush3.msra.mxu1 %v3759_v3 }
  0x2f   : > { %3398 = vmatmul.mubr.f32.gmra.mxu1 %v332_v41  ;;  %3381 = vmatprep.mubr.f32.mxu0 %v3810_v32 }
  0x30   : > { %3400 = vmatprep.mubr.f32.mxu1 %v342_v50  ;;  %3407 = vmatpush3.msra.mxu0 %v3773_v6 }
  0x31   : > { %3408 = vmatprep.subr.mxu0 %v3777_v7  ;;  %3445 = vmatprep.subr.mxu1 %v3703_v2 }
  0x32   : > { %3382 = vmatmul.mubr.f32.gmra.mxu0 %v3813_v33 }
  0x33   : > { %3401 = vmatmul.mubr.f32.gmra.mxu1 %v352_v51  ;;  %3384 = vmatprep.mubr.f32.mxu0 %v3826_v42 }
  0x34   : > { %3403 = vmatprep.mubr.f32.mxu1 %v362_v58  ;;  %3409 = vmatpush3.msra.mxu0 %v3777_v7 }
  0x35   : > { %3438 = vmatprep.subr.mxu0 %v3703_v2 }
  0x36   : > { %3385 = vmatmul.mubr.f32.gmra.mxu0 %v3829_v43 }
  0x37   : > { %3404 = vmatmul.mubr.f32.gmra.mxu1 %v372_v61  ;;  %3387 = vmatprep.mubr.f32.mxu0 %v361_v54 }
  0x38   : > { %3426 = vmatprep.mubr.f32.mxu1 %v3790_v18 }
  0x3a   : > { %3388 = vmatmul.mubr.f32.gmra.mxu0 %v371_v55 }
  0x3b   : > { %3427 = vmatmul.mubr.f32.vlgmr.msra.gmra.mxu1 %v3792_v19  ;;  %3410 = vmatprep.mubr.f32.mxu0 %v3790_v18 }
  0x3c   : > { %3429 = vmatprep.mubr.f32.mxu1 %v3796_v24 }
  0x3e   : > { %3411 = vmatmul.mubr.f32.vlgmr.msra.gmra.mxu0 %v3792_v19 }
  0x3f   : > { %3430 = vmatmul.mubr.f32.gmra.mxu1 %v3798_v25  ;;  %3413 = vmatprep.mubr.f32.mxu0 %v3796_v24 }
  0x40   : > { %3432 = vmatprep.mubr.f32.mxu1 %v3815_v34 }
  0x42   : > { %3414 = vmatmul.mubr.f32.gmra.mxu0 %v3798_v25  ;;  %v993_v25 = vld [vmem:[%s4261_s2] sm:$0xff] }
  0x43   : > { %3433 = vmatmul.mubr.f32.gmra.mxu1 %v3817_v35  ;;  %3416 = vmatprep.mubr.f32.mxu0 %v3815_v34  ;;  %v995_v28 = vsel %vm208_vm0, %v993_v25, 0 }
  0x44   : > { %3435 = vmatprep.mubr.f32.mxu1 %v3833_v46  ;;  %v3919_v33 = vand.u32 4294901760, %v995_v28 }
  0x46   : > { %3417 = vmatmul.mubr.f32.gmra.mxu0 %v3817_v35  ;;  %v3928_v38 = vsub.f32 %v995_v28, %v3919_v33 }
  0x47   : > { %3436 = vmatmul.mubr.f32.gmra.mxu1 %v3835_v47  ;;  %3419 = vmatprep.mubr.f32.mxu0 %v3833_v46 }
  0x48   : > { %3449 = vmatprep.mubr.msk.f32.mxu1 %vm3704_vm1, %v3703_v2  ;;  %v3937_v46 = vand.u32 4294901760, %v3928_v38 }
  0x4a   : > { %3420 = vmatmul.mubr.f32.gmra.mxu0 %v3835_v47  ;;  %v1067_v56 = vsub.f32 %v3928_v38, %v3937_v46 }
  0x4b   : > { %3442 = vmatprep.mubr.msk.f32.mxu0 %vm3704_vm1, %v3703_v2 }
  0xdb   : > { %v3364_v3 = vpop.f32.mrf.mxu1 }
  0xdd   : > { %v457_v4 = vpop.f32.mrf.mxu1 }
  0xde   : > { %v3348_v5 = vpop.f32.mrf.mxu0 }
  0xdf   : > { %v3367_v6 = vpop.f32.mrf.mxu1  ;;  %v464_v36 = vadd.f32 %v3364_v3, %v3348_v5  ;;  %v3943_v3 = vand.u32 4294901760, %v1067_v56 }
  0xe0   : > { %v306_v7 = vpop.f32.mrf.mxu0 }
  0xe1   : > { %v469_v10 = vpop.f32.mrf.mxu1  ;;  %v458_v39 = vadd.f32 %v457_v4, %v306_v7 }
  0xe2   : > { %v3351_v11 = vpop.f32.mrf.mxu0 }
  0xe3   : > { %v3895_v12 = vpop.f32.mrf.mxu1  ;;  %v476_v44 = vadd.f32 %v3367_v6, %v3351_v11 }
  0xe4   : > { %v326_v13 = vpop.f32.mrf.mxu0 }
  0xe5   : > { %v3897_v14 = vpop.f32.mrf.mxu1  ;;  %v470_v49 = vadd.f32 %v469_v10, %v326_v13 }
  0xe6   : > { %v3899_v15 = vpop.f32.mrf.mxu0 }
  0xe7   : > { %v3901_v16 = vpop.f32.mrf.mxu1 }
  0xe8   : > { %v3903_v17 = vpop.f32.mrf.mxu0 }
  0xe9   : > { %v3905_v18 = vpop.f32.mrf.mxu1 }
  0xea   : > { %v3907_v19 = vpop.f32.mrf.mxu0 }
  0xeb   : > { %v3396_v20 = vpop.f32.mrf.mxu1 }
  0xec   : > { %v3909_v21 = vpop.f32.mrf.mxu0 }
  0xed   : > { %v699_v22 = vpop.f32.mrf.mxu1 }
  0xee   : > { %v3380_v23 = vpop.f32.mrf.mxu0 }
  0xef   : > { %v3399_v24 = vpop.f32.mrf.mxu1  ;;  %v583_v40 = vadd.f32 %v3380_v23, %v464_v36 }
  0xf0   : > { %v575_v26 = vpop.f32.mrf.mxu0 }
  0xf1   : > { %v715_v27 = vpop.f32.mrf.mxu1  ;;  %v576_v43 = vadd.f32 %v575_v26, %v458_v39  ;;  %v708_v47 = vadd.f32 %v3396_v20, %v583_v40 }
  0xf2   : > { %v3383_v29 = vpop.f32.mrf.mxu0 }
  0xf3   : > { %v3915_v30 = vpop.f32.mrf.mxu1  ;;  %v597_v50 = vadd.f32 %v3383_v29, %v476_v44  ;;  %v700_v52 = vadd.f32 %v699_v22, %v576_v43 }
  0xf4   : > { %v589_v31 = vpop.f32.mrf.mxu0 }
  0xf5   : > { %v3917_v32 = vpop.f32.mrf.mxu1  ;;  %v590_v54 = vadd.f32 %v589_v31, %v470_v49  ;;  %v724_v60 = vadd.f32 %v3399_v24, %v597_v50  ;;  %v482_v31 = vadd.f32 %v3897_v14, %v3903_v17 }
  0xf6   : > { %v3921_v34 = vpop.f32.mrf.mxu0 }
  0xf7   : > { %v3923_v35 = vpop.f32.mrf.mxu1  ;;  %v716_v1 = vadd.f32 %v715_v27, %v590_v54  ;;  %v488_v27 = vadd.f32 %v3895_v12, %v3899_v15 }
  0xf8   : > { %v3925_v37 = vpop.f32.mrf.mxu0 }
  0xf9   : > { %v3930_v41 = vpop.f32.mrf.mxu1  ;;  %v611_v36 = vadd.f32 %v3921_v34, %v488_v27  ;;  %v604_v15 = vadd.f32 %v3925_v37, %v482_v31 }
  0xfa   : > { %v3932_v42 = vpop.f32.mrf.mxu0 }
  0xfb   : > { %v3428_v48 = vpop.f32.mrf.mxu1  ;;  %v740_v14 = vadd.f32 %v3915_v30, %v611_v36  ;;  %v732_v37 = vadd.f32 %v3917_v32, %v604_v15 }
  0xfc   : > { %v3934_v45 = vpop.f32.mrf.mxu0 }
  0xfd   : > { %v947_v59 = vpop.f32.mrf.mxu1 }
  0xfe   : > { %v3412_v51 = vpop.f32.mrf.mxu0 }
  0xff   : > { %v839_v53 = vadd.f32 %v3412_v51, %v708_v47  ;;  %v3431_v0 = vpop.f32.mrf.mxu1 }
 0x100   : > { %v832_v55 = vpop.f32.mrf.mxu0 }
 0x101   : > { %v954_v57 = vadd.f32 %v3428_v48, %v839_v53  ;;  %v833_v58 = vadd.f32 %v832_v55, %v700_v52  ;;  %v959_v11 = vpop.f32.mrf.mxu1  ;;  %v500_v55 = vadd.f32 %v3901_v16, %v3907_v19 }
 0x102   : > { %v3415_v61 = vpop.f32.mrf.mxu0 }
 0x103   : > { %v3941_v62 = vand.u32 4294901760, %v954_v57  ;;  %v948_v63 = vadd.f32 %v947_v59, %v833_v58  ;;  %v851_v8 = vadd.f32 %v3415_v61, %v724_v60  ;;  %v3434_v43 = vpop.f32.mrf.mxu1  ;;  %v625_v58 = vadd.f32 %v3932_v42, %v500_v55 }
 0x104   : > { %v844_v9 = vpop.f32.mrf.mxu0 }
 0x105   : > { %v1104_v4 = vsub.f32 %v954_v57, %v3941_v62  ;;  %v3946_v5 = vand.u32 4294901760, %v948_v63  ;;  %3439 = vmatpush3.msra.mxu0 %v3941_v62  ;;  %v845_v6 = vadd.f32 %v844_v9, %v716_v1  ;;  %v966_v13 = vadd.f32 %v3431_v0, %v851_v8  ;;  %v971_v49 = vpop.f32.mrf.mxu1 }
 0x106   : > { %3440 = vmatprep.subr.mxu0 %v3703_v2  ;;  %v3418_v12 = vpop.f32.mrf.mxu0  ;;  %v494_v57 = vadd.f32 %v3905_v18, %v3909_v21  ;;  %v756_v18 = vadd.f32 %v3923_v35, %v625_v58 }
 0x107   : > { %v1105_v7 = vand.u32 4294901760, %v1104_v4  ;;  %v1111_v10 = vsub.f32 %v948_v63, %v3946_v5  ;;  %3441 = vmatpush3.msra.mxu0 %v3946_v5  ;;  %v960_v23 = vadd.f32 %v959_v11, %v845_v6  ;;  %v3957_v25 = vand.u32 4294901760, %v966_v13  ;;  %v3437_v61 = vpop.f32.mrf.mxu1 }
 0x108   : > { %3452 = vmatprep.subr.mxu0 %v3703_v2  ;;  %3443 = vmatmul.mubr.f32.vlgmr.msra.gmra.mxu0 %v3943_v3  ;;  %v856_v34 = vpop.f32.mrf.mxu0  ;;  %v863_v44 = vadd.f32 %v3418_v12, %v740_v14  ;;  %v618_v19 = vadd.f32 %v3934_v45, %v494_v57 }
 0x109   : > { %v1106_v20 = vsub.f32 %v1104_v4, %v1105_v7  ;;  %v1112_v22 = vand.u32 4294901760, %v1111_v10  ;;  %3453 = vmatpush3.msra.mxu0 %v1104_v4  ;;  %3456 = vmatprep.mubr.msk.f32.mxu0 %vm3704_vm1, %v3703_v2  ;;  %v3965_v28 = vand.u32 4294901760, %v960_v23  ;;  %v1563_v39 = vsub.f32 %v966_v13, %v3957_v25  ;;  %v983_v1 = vpop.f32.mrf.mxu1 }
 0x10a   : > { %3454 = vmatprep.subr.mxu0 %v3703_v2  ;;  %v857_v48 = vadd.f32 %v856_v34, %v732_v37  ;;  %v978_v50 = vadd.f32 %v3434_v43, %v863_v44  ;;  %v3421_v16 = vpop.f32.mrf.mxu0  ;;  %v748_v45 = vadd.f32 %v3930_v41, %v618_v19 }
 0x10b   : > { %v1113_v24 = vsub.f32 %v1111_v10, %v1112_v22  ;;  %3455 = vmatpush3.msra.mxu0 %v1111_v10  ;;  %v1107_v26 = vand.u32 4294901760, %v1106_v20  ;;  %v1570_v40 = vsub.f32 %v960_v23, %v3965_v28  ;;  %v1564_v17 = vand.u32 4294901760, %v1563_v39 }
 0x10c   : > { %3466 = vmatprep.subr.mxu0 %v3703_v2  ;;  %3457 = vmatmul.mubr.f32.vlgmr.msra.gmra.mxu0 %v3928_v38  ;;  %v972_v51 = vadd.f32 %v971_v49, %v857_v48  ;;  %v4006_v53 = vand.u32 4294901760, %v978_v50  ;;  %v868_v42 = vpop.f32.mrf.mxu0 }
 0x10d   : > { %3467 = vmatpush3.msra.mxu0 %v1105_v7  ;;  %3470 = vmatprep.mubr.msk.f32.mxu0 %vm3704_vm1, %v3703_v2  ;;  %v1114_v29 = vand.u32 4294901760, %v1113_v24  ;;  %v1571_v47 = vand.u32 4294901760, %v1570_v40  ;;  %v1565_v30 = vsub.f32 %v1563_v39, %v1564_v17  ;;  %v869_v0 = vadd.f32 %v868_v42, %v748_v45 }
 0x10e   : > { %3446 = vmatpush3.msra.mxu1 %v1107_v26  ;;  %3468 = vmatprep.subr.mxu0 %v3703_v2  ;;  %v4012_v56 = vand.u32 4294901760, %v972_v51  ;;  %v2022_v59 = vsub.f32 %v978_v50, %v4006_v53 }
 0x10f   : > { %3447 = vmatprep.subr.mxu1 %v3703_v2  ;;  %3469 = vmatpush3.msra.mxu0 %v1112_v22  ;;  %v1572_v32 = vsub.f32 %v1570_v40, %v1571_v47  ;;  %v1566_v52 = vand.u32 4294901760, %v1565_v30  ;;  %v984_v9 = vadd.f32 %v983_v1, %v869_v0  ;;  %v3710_v0 = vmov 4  }
 0x110   : > { %3448 = vmatpush3.msra.mxu1 %v1114_v29  ;;  %3480 = vmatprep.subr.mxu0 %v3703_v2  ;;  %v2029_v60 = vsub.f32 %v972_v51, %v4012_v56  ;;  %v2023_v21 = vand.u32 4294901760, %v2022_v59 }
 0x111   : > { %3450 = vmatmul.mubr.f32.vlgmr.msra.gmra.mxu1 %v3919_v33  ;;  %3459 = vmatprep.subr.mxu1 %v3703_v2  ;;  %v1573_v54 = vand.u32 4294901760, %v1572_v32  ;;  %v2406_v7 = vand.u32 4294901760, %v984_v9 }
 0x112   : > { %3460 = vmatpush3.msra.mxu1 %v3941_v62  ;;  %3471 = vmatmul.mubr.f32.vlgmr.msra.gmra.mxu0 %v3919_v33  ;;  %v2030_v63 = vand.u32 4294901760, %v2029_v60  ;;  %v2024_v35 = vsub.f32 %v2022_v59, %v2023_v21 }
 0x113   : > { %3481 = vmatpush3.msra.mxu0 %v3957_v25  ;;  %3461 = vmatprep.subr.mxu1 %v3703_v2  ;;  %v2488_v11 = vsub.f32 %v984_v9, %v2406_v7 }
 0x114   : > { %3482 = vmatprep.subr.mxu0 %v3703_v2  ;;  %3462 = vmatpush3.msra.mxu1 %v3946_v5  ;;  %v2031_v41 = vsub.f32 %v2029_v60, %v2030_v63  ;;  %v2025_v4 = vand.u32 4294901760, %v2024_v35  ;;  %v3709_v35 = vmov 5  }
 0x115   : > { %3463 = vmatprep.mubr.msk.f32.mxu1 %vm3704_vm1, %v3703_v2  ;;  %3483 = vmatpush3.msra.mxu0 %v3965_v28  ;;  %v2489_v20 = vand.u32 4294901760, %v2488_v11 }
 0x116   : > { %3464 = vmatmul.mubr.f32.vlgmr.msra.gmra.mxu1 %v3937_v46  ;;  %3473 = vmatprep.subr.mxu1 %v3703_v2  ;;  %v2032_v6 = vand.u32 4294901760, %v2031_v41 }
 0x117   : > { %3484 = vmatprep.mubr.msk.f32.mxu0 %vm3704_vm1, %v3703_v2  ;;  %3494 = vmatprep.subr.mxu0 %v3703_v2  ;;  %v2490_v23 = vsub.f32 %v2488_v11, %v2489_v20 }
 0x118   : > { %3474 = vmatpush3.msra.mxu1 %v3941_v62  ;;  %3485 = vmatmul.mubr.f32.vlgmr.msra.gmra.mxu0 %v3943_v3  ;;  %v875_v62 = vadd.f32 %v3421_v16, %v756_v18  ;;  %v3707_v18 = vmov 3  }
 0x119   : > { %3495 = vmatpush3.msra.mxu0 %v1563_v39  ;;  %3475 = vmatprep.subr.mxu1 %v3703_v2 }
 0x11a   : > { %3496 = vmatprep.subr.mxu0 %v3703_v2  ;;  %3476 = vmatpush3.msra.mxu1 %v3946_v5  ;;  %v990_v8 = vadd.f32 %v3437_v61, %v875_v62 }
 0x11b   : > { %3477 = vmatprep.mubr.msk.f32.mxu1 %vm3704_vm1, %v3703_v2  ;;  %3497 = vmatpush3.msra.mxu0 %v1570_v40 }
 0x11c   : > { %3478 = vmatmul.mubr.f32.vlgmr.msra.gmra.mxu1 %v3919_v33  ;;  %3487 = vmatprep.subr.mxu1 %v3703_v2  ;;  %v4056_v5 = vand.u32 4294901760, %v990_v8 }
 0x11d   : > { %3498 = vmatprep.mubr.msk.f32.mxu0 %vm3704_vm1, %v3703_v2  ;;  %3508 = vmatprep.subr.mxu0 %v3703_v2 }
 0x11e   : > { %3488 = vmatpush3.msra.mxu1 %v1566_v52  ;;  %3499 = vmatmul.mubr.f32.vlgmr.msra.gmra.mxu0 %v3928_v38  ;;  %v2481_v10 = vsub.f32 %v990_v8, %v4056_v5 }
 0x11f   : > { %3509 = vmatpush3.msra.mxu0 %v1564_v17  ;;  %3489 = vmatprep.subr.mxu1 %v3703_v2 }
 0x120   : > { %3510 = vmatprep.subr.mxu0 %v3703_v2  ;;  %3490 = vmatpush3.msra.mxu1 %v1573_v54  ;;  %v2482_v13 = vand.u32 4294901760, %v2481_v10 }
 0x121   : > { %3511 = vmatpush3.msra.mxu0 %v1571_v47  ;;  %3491 = vmatprep.mubr.msk.f32.mxu1 %vm3704_vm1, %v3703_v2 }
 0x122   : > { %3501 = vmatprep.subr.mxu1 %v3703_v2  ;;  %3512 = vmatprep.mubr.msk.f32.mxu0 %vm3704_vm1, %v3703_v2  ;;  %v2483_v22 = vsub.f32 %v2481_v10, %v2482_v13 }
 0x123   : > { %3522 = vmatprep.subr.mxu0 %v3703_v2  ;;  %3492 = vmatmul.mubr.f32.vlgmr.msra.gmra.mxu1 %v3919_v33 }
 0x124   : > { %3502 = vmatpush3.msra.mxu1 %v3957_v25  ;;  %3513 = vmatmul.mubr.f32.vlgmr.msra.gmra.mxu0 %v3919_v33  ;;  %v2484_v24 = vand.u32 4294901760, %v2483_v22 }
 0x125   : > { %3523 = vmatpush3.msra.mxu0 %v4006_v53  ;;  %3503 = vmatprep.subr.mxu1 %v3703_v2 }
 0x126   : > { %3524 = vmatprep.subr.mxu0 %v3703_v2  ;;  %3504 = vmatpush3.msra.mxu1 %v3965_v28 }
 0x127   : > { %3525 = vmatpush3.msra.mxu0 %v4012_v56  ;;  %3505 = vmatprep.mubr.msk.f32.mxu1 %vm3704_vm1, %v3703_v2 }
 0x128   : > { %3515 = vmatprep.subr.mxu1 %v3703_v2  ;;  %3526 = vmatprep.mubr.msk.f32.mxu0 %vm3704_vm1, %v3703_v2 }
 0x129   : > { %3536 = vmatprep.subr.mxu0 %v3703_v2  ;;  %3506 = vmatmul.mubr.f32.vlgmr.msra.gmra.mxu1 %v3937_v46 }
 0x12a   : > { %3516 = vmatpush3.msra.mxu1 %v3957_v25  ;;  %3527 = vmatmul.mubr.f32.vlgmr.msra.gmra.mxu0 %v3943_v3  ;;  %v3706_v25 = vmov 0  }
 0x12b   : > { %3537 = vmatpush3.msra.mxu0 %v2022_v59  ;;  %3517 = vmatprep.subr.mxu1 %v3703_v2 }
 0x12c   : > { %3538 = vmatprep.subr.mxu0 %v3703_v2  ;;  %3518 = vmatpush3.msra.mxu1 %v3965_v28 }
 0x12d   : > { %3539 = vmatpush3.msra.mxu0 %v2029_v60  ;;  %3519 = vmatprep.mubr.msk.f32.mxu1 %vm3704_vm1, %v3703_v2 }
 0x12e   : > { %3529 = vmatprep.subr.mxu1 %v3703_v2  ;;  %3540 = vmatprep.mubr.msk.f32.mxu0 %vm3704_vm1, %v3703_v2 }
 0x12f   : > { %3550 = vmatprep.subr.mxu0 %v3703_v2  ;;  %3520 = vmatmul.mubr.f32.vlgmr.msra.gmra.mxu1 %v3919_v33 }
 0x130   : > { %3530 = vmatpush3.msra.mxu1 %v2025_v4  ;;  %3541 = vmatmul.mubr.f32.vlgmr.msra.gmra.mxu0 %v3928_v38 }
 0x131   : > { %3551 = vmatpush3.msra.mxu0 %v2023_v21  ;;  %3531 = vmatprep.subr.mxu1 %v3703_v2  ;;  %v3708_v21 = vmov 1  }
 0x132   : > { %3552 = vmatprep.subr.mxu0 %v3703_v2  ;;  %3532 = vmatpush3.msra.mxu1 %v2032_v6  ;;  %v3711_v6 = vmov 7  }
 0x133   : > { %3553 = vmatpush3.msra.mxu0 %v2030_v63  ;;  %3533 = vmatprep.mubr.msk.f32.mxu1 %vm3704_vm1, %v3703_v2 }
 0x134   : > { %3543 = vmatprep.subr.mxu1 %v3703_v2  ;;  %3554 = vmatprep.mubr.msk.f32.mxu0 %vm3704_vm1, %v3703_v2 }
 0x135   : > { %3564 = vmatprep.subr.mxu0 %v3703_v2  ;;  %3534 = vmatmul.mubr.f32.vlgmr.msra.gmra.mxu1 %v3919_v33 }
 0x136   : > { %3544 = vmatpush3.msra.mxu1 %v4006_v53  ;;  %3555 = vmatmul.mubr.f32.vlgmr.msra.gmra.mxu0 %v3919_v33 }
 0x137   : > { %3565 = vmatpush3.msra.mxu0 %v4056_v5  ;;  %3545 = vmatprep.subr.mxu1 %v3703_v2 }
 0x138   : > { %3566 = vmatprep.subr.mxu0 %v3703_v2  ;;  %3546 = vmatpush3.msra.mxu1 %v4012_v56 }
 0x139   : > { %3567 = vmatpush3.msra.mxu0 %v2406_v7  ;;  %3547 = vmatprep.mubr.msk.f32.mxu1 %vm3704_vm1, %v3703_v2 }
 0x13a   : > { %3557 = vmatprep.subr.mxu1 %v3703_v2  ;;  %3568 = vmatprep.mubr.msk.f32.mxu0 %vm3704_vm1, %v3703_v2 }
 0x13b   : > { %3578 = vmatprep.subr.mxu0 %v3703_v2  ;;  %3548 = vmatmul.mubr.f32.vlgmr.msra.gmra.mxu1 %v3937_v46 }
 0x13c   : > { %3558 = vmatpush3.msra.mxu1 %v4006_v53  ;;  %3569 = vmatmul.mubr.f32.vlgmr.msra.gmra.mxu0 %v3943_v3  ;;  %v2491_v3 = vand.u32 4294901760, %v2490_v23 }
 0x13d   : > { %3579 = vmatpush3.msra.mxu0 %v2481_v10  ;;  %3559 = vmatprep.subr.mxu1 %v3703_v2 }
 0x13e   : > { %3580 = vmatprep.subr.mxu0 %v3703_v2  ;;  %3560 = vmatpush3.msra.mxu1 %v4012_v56 }
 0x13f   : > { %3581 = vmatpush3.msra.mxu0 %v2488_v11  ;;  %3561 = vmatprep.mubr.msk.f32.mxu1 %vm3704_vm1, %v3703_v2 }
 0x140   : > { %3571 = vmatprep.subr.mxu1 %v3703_v2  ;;  %3582 = vmatprep.mubr.msk.f32.mxu0 %vm3704_vm1, %v3703_v2 }
 0x141   : > { %3592 = vmatprep.subr.mxu0 %v3703_v2  ;;  %3562 = vmatmul.mubr.f32.vlgmr.msra.gmra.mxu1 %v3919_v33 }
 0x142   : > { %3572 = vmatpush3.msra.mxu1 %v2484_v24  ;;  %3583 = vmatmul.mubr.f32.vlgmr.msra.gmra.mxu0 %v3928_v38  ;;  %v3705_v38 = vmov 2  }
 0x143   : > { %3593 = vmatpush3.msra.mxu0 %v2482_v13  ;;  %3573 = vmatprep.subr.mxu1 %v3703_v2 }
 0x144   : > { %3594 = vmatprep.subr.mxu0 %v3703_v2  ;;  %3574 = vmatpush3.msra.mxu1 %v2491_v3 }
 0x145   : > { %3595 = vmatpush3.msra.mxu0 %v2489_v20  ;;  %3575 = vmatprep.mubr.msk.f32.mxu1 %vm3704_vm1, %v3703_v2 }
 0x146   : > { %3585 = vmatprep.subr.mxu1 %v3703_v2  ;;  %3576 = vmatmul.mubr.f32.vlgmr.msra.gmra.mxu1 %v3919_v33 }
 0x147   : > { %3586 = vmatpush3.msra.mxu1 %v4056_v5  ;;  %3589 = vmatprep.mubr.msk.f32.mxu1 %vm3704_vm1, %v3703_v2 }
 0x148   : > { %3587 = vmatprep.subr.mxu1 %v3703_v2  ;;  %3596 = vmatprep.mubr.msk.f32.mxu0 %vm3704_vm1, %v3703_v2 }
 0x149   : > { %3588 = vmatpush3.msra.mxu1 %v2406_v7  ;;  %3597 = vmatmul.mubr.f32.vlgmr.msra.gmra.mxu0 %v3919_v33 }
 0x14a   : > { %3599 = vmatprep.subr.mxu1 %v3703_v2  ;;  %3590 = vmatmul.mubr.f32.vlgmr.msra.gmra.mxu1 %v3937_v46 }
 0x14b   : > { %3600 = vmatpush3.msra.mxu1 %v4056_v5  ;;  %3603 = vmatprep.mubr.msk.f32.mxu1 %vm3704_vm1, %v3703_v2 }
 0x14c   : > { %3601 = vmatprep.subr.mxu1 %v3703_v2  ;;  %3650 = vset.pattern.permute.xlu1 %v3705_v38 }
 0x14d   : > { %3602 = vmatpush3.msra.mxu1 %v2406_v7  ;;  %3648 = vset.pattern.permute.xlu0 %v3706_v25  ;;  %v3712_v7 = vmov 6  }
 0x14e   : > { %3604 = vmatmul.mubr.f32.vlgmr.msra.gmra.mxu1 %v3919_v33 }
 0x1c8   : > { %v1070_v26 = vpop.f32.mrf.mxu0 }
 0x1ca   : > { %v3444_v27 = vpop.f32.mrf.mxu0 }
 0x1cc   : > { %v1227_v28 = vpop.f32.mrf.mxu0 }
 0x1ce   : > { %v3458_v46 = vpop.f32.mrf.mxu0 }
 0x1d1   : > { %v1151_v29 = vpop.f32.mrf.mxu1 }
 0x1d2   : > { %v1152_v31 = vadd.f32 %v1151_v29, %v1070_v26  ;;  %v1379_v36 = vpop.f32.mrf.mxu0 }
 0x1d3   : > { %v3451_v39 = vpop.f32.mrf.mxu1 }
 0x1d4   : > { %v1228_v12 = vadd.f32 %v1227_v28, %v1152_v31  ;;  %v3472_v15 = vpop.f32.mrf.mxu0 }
 0x1d6   : > { %v1302_v40 = vpop.f32.mrf.mxu1 }
 0x1d7   : > { %v1303_v14 = vadd.f32 %v1302_v40, %v1228_v12 }
 0x1d8   : > { %v3465_v17 = vpop.f32.mrf.mxu1  ;;  %v1529_v33 = vpop.f32.mrf.mxu0 }
 0x1d9   : > { %v1380_v34 = vadd.f32 %v1379_v36, %v1303_v14 }
 0x1da   : > { %v3486_v43 = vpop.f32.mrf.mxu0 }
 0x1dc   : > { %v1452_v37 = vpop.f32.mrf.mxu1 }
 0x1dd   : > { %v1453_v44 = vadd.f32 %v1452_v37, %v1380_v34 }
 0x1de   : > { %v3479_v47 = vpop.f32.mrf.mxu1  ;;  %v1686_v30 = vpop.f32.mrf.mxu0 }
 0x1df   : > { %v2845_v48 = vmul.f32 25.0, %v1453_v44  ;;  %vm2833_vm2 = vcmp.ge.f32.partialorder %v1453_v44, 0.0  ;;  %vm2837_vm3 = vcmp.le.f32.partialorder %v1453_v44, 1.0 }
 0x1e0   : > { %v3500_v49 = vpop.f32.mrf.mxu0  ;;  %vm2841_vm4 = vmand %vm2833_vm2, %vm2837_vm3 }
 0x1e1   : > { %v2849_v32 = vmin.f32 %v2845_v48, 24.0 }
 0x1e3   : > { %v3606_v50 = vtrunc.f32 %v2849_v32  ;;  %v1610_v51 = vpop.f32.mrf.mxu1 }
 0x1e4   : > { %v1611_v52 = vadd.f32 %v1610_v51, %v1529_v33  ;;  %v1838_v53 = vpop.f32.mrf.mxu0 }
 0x1e5   : > { %v3607_v54 = vcvt.f32.s32 %v3606_v50  ;;  %v3493_v55 = vpop.f32.mrf.mxu1 }
 0x1e6   : > { %v1687_v56 = vadd.f32 %v1686_v30, %v1611_v52  ;;  %v3514_v57 = vpop.f32.mrf.mxu0 }
 0x1e7   : > { %v2857_v58 = vsel %vm2841_vm4, %v3607_v54, 4294967295 }
 0x1e8   : > { %2920 = vperm.xlu1 %3650, %v2857_v58   ;;  %2864 = vperm.xlu0 %3648, %v2857_v58  }
 0x1e9   : > { %v1761_v59 = vpop.f32.mrf.mxu1 }
 0x1ea   : > { %v1762_v16 = vadd.f32 %v1761_v59, %v1687_v56  ;;  %v1988_v19 = vpop.f32.mrf.mxu0 }
 0x1eb   : > { %v3507_v60 = vpop.f32.mrf.mxu1 }
 0x1ec   : > { %3651 = vset.pattern.permute.xlu1 %v3707_v18  ;;  %3649 = vset.pattern.permute.xlu0 %v3708_v21  ;;  %v1839_v42 = vadd.f32 %v1838_v53, %v1762_v16  ;;  %v3528_v61 = vpop.f32.mrf.mxu0 }
 0x1ed   : > { %2948 = vperm.xlu1 %3651, %v2857_v58   ;;  %2892 = vperm.xlu0 %3649, %v2857_v58  }
 0x1ef   : > { %v1911_v45 = vpop.f32.mrf.mxu1 }
 0x1f0   : > { %v1912_v62 = vadd.f32 %v1911_v45, %v1839_v42  ;;  %v2145_v63 = vpop.f32.mrf.mxu0 }
 0x1f1   : > { %3653 = vset.pattern.permute.xlu1 %v3709_v35  ;;  %3652 = vset.pattern.permute.xlu0 %v3710_v0  ;;  %v3521_v1 = vpop.f32.mrf.mxu1 }
 0x1f2   : > { %v2846_v41 = vmul.f32 25.0, %v1912_v62  ;;  %3004 = vperm.xlu1 %3653, %v2857_v58   ;;  %2976 = vperm.xlu0 %3652, %v2857_v58   ;;  %v3542_v8 = vpop.f32.mrf.mxu0  ;;  %vm2834_vm5 = vcmp.ge.f32.partialorder %v1912_v62, 0.0  ;;  %vm2838_vm6 = vcmp.le.f32.partialorder %v1912_v62, 1.0 }
 0x1f3   : > { %vm2842_vm7 = vmand %vm2834_vm5, %vm2838_vm6 }
 0x1f4   : > { %v2850_v9 = vmin.f32 %v2846_v41, 24.0 }
 0x1f5   : > { %v2069_v4 = vpop.f32.mrf.mxu1 }
 0x1f6   : > { %v3608_v5 = vtrunc.f32 %v2850_v9  ;;  %3655 = vset.pattern.permute.xlu1 %v3711_v6  ;;  %3654 = vset.pattern.permute.xlu0 %v3712_v7  ;;  %v2070_v10 = vadd.f32 %v2069_v4, %v1988_v19  ;;  %v2297_v11 = vpop.f32.mrf.mxu0  ;;  %v2861_v9 = vlaneseq }
 0x1f7   : > { %3060 = vperm.xlu1 %3655, %v2857_v58   ;;  %3032 = vperm.xlu0 %3654, %v2857_v58   ;;  %v3535_v13 = vpop.f32.mrf.mxu1 }
 0x1f8   : > { %v3609_v20 = vcvt.f32.s32 %v3608_v5  ;;  %v2146_v22 = vadd.f32 %v2145_v63, %v2070_v10  ;;  %v3556_v23 = vpop.f32.mrf.mxu0 }
 0x1fa   : > { %v4123_v24 = vsel %vm2842_vm7, %v3609_v20, 4294967295 }
 0x1fb   : > { %v2220_v3 = vpop.f32.mrf.mxu1  ;;  %3657 = vset.pattern.permute.xlu1 %v3708_v21  ;;  %3656 = vset.pattern.permute.xlu0 %v3706_v25 }
 0x1fc   : > { %v2221_v26 = vadd.f32 %v2220_v3, %v2146_v22  ;;  %2895 = vperm.xlu1 %3657, %v4123_v24   ;;  %2867 = vperm.xlu0 %3656, %v4123_v24   ;;  %v2447_v27 = vpop.f32.mrf.mxu0 }
 0x1fd   : > { %v3549_v28 = vpop.f32.mrf.mxu1 }
 0x1fe   : > { %v2298_v46 = vadd.f32 %v2297_v11, %v2221_v26  ;;  %v3570_v29 = vpop.f32.mrf.mxu0 }
 0x200   : > { %3660 = vset.pattern.permute.xlu1 %v3710_v0  ;;  %3658 = vset.pattern.permute.xlu0 %v3705_v38 }
 0x201   : > { %v2370_v31 = vpop.f32.mrf.mxu1  ;;  %2979 = vperm.xlu1 %3660, %v4123_v24   ;;  %2923 = vperm.xlu0 %3658, %v4123_v24  }
 0x202   : > { %v2371_v36 = vadd.f32 %v2370_v31, %v2298_v46  ;;  %v2604_v39 = vpop.f32.mrf.mxu0 }
 0x203   : > { %v3563_v12 = vpop.f32.mrf.mxu1 }
 0x204   : > { %v2847_v15 = vmul.f32 25.0, %v2371_v36  ;;  %v3584_v40 = vpop.f32.mrf.mxu0  ;;  %vm2835_vm8 = vcmp.ge.f32.partialorder %v2371_v36, 0.0  ;;  %vm2839_vm9 = vcmp.le.f32.partialorder %v2371_v36, 1.0 }
 0x205   : > { %3662 = vset.pattern.permute.xlu1 %v3712_v7  ;;  %3659 = vset.pattern.permute.xlu0 %v3707_v18  ;;  %vm2843_vm10 = vmand %vm2835_vm8, %vm2839_vm9 }
 0x206   : > { %v2851_v14 = vmin.f32 %v2847_v15, 24.0  ;;  %3035 = vperm.xlu1 %3662, %v4123_v24   ;;  %2951 = vperm.xlu0 %3659, %v4123_v24   ;;  %v2528_v17 = vpop.f32.mrf.mxu1 }
 0x207   : > { %v2529_v33 = vadd.f32 %v2528_v17, %v2447_v27 }
 0x208   : > { %v3610_v34 = vtrunc.f32 %v2851_v14  ;;  %v3577_v43 = vpop.f32.mrf.mxu1 }
 0x209   : > { %v2605_v37 = vadd.f32 %v2604_v39, %v2529_v33  ;;  %v2756_v44 = vpop.f32.mrf.mxu0 }
 0x20a   : > { %v3611_v47 = vcvt.f32.s32 %v3610_v34  ;;  %3663 = vset.pattern.permute.xlu1 %v3706_v25  ;;  %3661 = vset.pattern.permute.xlu0 %v3709_v35  ;;  %v2679_v30 = vpop.f32.mrf.mxu1 }
 0x20b   : > { %v2680_v48 = vadd.f32 %v2679_v30, %v2605_v37  ;;  %3007 = vperm.xlu0 %3661, %v4123_v24   ;;  %v3598_v49 = vpop.f32.mrf.mxu0 }
 0x20c   : > { %v2859_v32 = vsel %vm2843_vm10, %v3611_v47, 4294967295  ;;  %v3591_v50 = vpop.f32.mrf.mxu1 }
 0x20d   : > { %2870 = vperm.xlu1 %3663, %v2859_v32   ;;  %v2757_v51 = vadd.f32 %v2756_v44, %v2680_v48 }
 0x20e   : > { %v2829_v52 = vpop.f32.mrf.mxu1 }
 0x20f   : > { %v2830_v53 = vadd.f32 %v2829_v52, %v2757_v51  ;;  %3667 = vset.pattern.permute.xlu0 %v3710_v0 }
 0x210   : > { %2982 = vperm.xlu0 %3667, %v2859_v32   ;;  %v3605_v54 = vpop.f32.mrf.mxu1 }
 0x211   : > { %v2848_v55 = vmul.f32 25.0, %v2830_v53  ;;  %3664 = vset.pattern.permute.xlu1 %v3708_v21  ;;  %vm2836_vm11 = vcmp.ge.f32.partialorder %v2830_v53, 0.0  ;;  %vm2840_vm12 = vcmp.le.f32.partialorder %v2830_v53, 1.0 }
 0x212   : > { %2898 = vperm.xlu1 %3664, %v2859_v32   ;;  %vm2844_vm13 = vmand %vm2836_vm11, %vm2840_vm12 }
 0x213   : > { %v2852_v56 = vmin.f32 %v2848_v55, 24.0 }
 0x214   : > { %3669 = vset.pattern.permute.xlu0 %v3712_v7 }
 0x215   : > { %v3612_v57 = vtrunc.f32 %v2852_v56  ;;  %3038 = vperm.xlu0 %3669, %v2859_v32  }
 0x216   : > { %3665 = vset.pattern.permute.xlu1 %v3705_v38 }
 0x217   : > { %v3613_v58 = vcvt.f32.s32 %v3612_v57  ;;  %2926 = vperm.xlu1 %3665, %v2859_v32  }
 0x219   : > { %v2860_v59 = vsel %vm2844_vm13, %v3613_v58, 4294967295  ;;  %3671 = vset.pattern.permute.xlu0 %v3708_v21 }
 0x21a   : > { %2901 = vperm.xlu0 %3671, %v2860_v59  }
 0x21b   : > { %3666 = vset.pattern.permute.xlu1 %v3707_v18 }
 0x21c   : > { %2954 = vperm.xlu1 %3666, %v2859_v32  }
 0x21e   : > { %3672 = vset.pattern.permute.xlu0 %v3711_v6 }
 0x21f   : > { %3063 = vperm.xlu0 %3672, %v4123_v24  }
 0x220   : > { %3668 = vset.pattern.permute.xlu1 %v3709_v35 }
 0x221   : > { %3010 = vperm.xlu1 %3668, %v2859_v32  }
 0x223   : > { %3069 = vperm.xlu0 %3672, %v2860_v59  }
 0x225   : > { %3670 = vset.pattern.permute.xlu1 %v3706_v25 }
 0x226   : > { %2873 = vperm.xlu1 %3670, %v2860_v59  }
 0x22a   : > { %3673 = vset.pattern.permute.xlu1 %v3705_v38 }
 0x22b   : > { %2929 = vperm.xlu1 %3673, %v2860_v59  }
 0x22f   : > { %3674 = vset.pattern.permute.xlu1 %v3707_v18 }
 0x230   : > { %2957 = vperm.xlu1 %3674, %v2860_v59  }
 0x234   : > { %3675 = vset.pattern.permute.xlu1 %v3710_v0 }
 0x235   : > { %2985 = vperm.xlu1 %3675, %v2860_v59  }
 0x239   : > { %3676 = vset.pattern.permute.xlu1 %v3709_v35 }
 0x23a   : > { %3013 = vperm.xlu1 %3676, %v2860_v59  }
 0x23e   : > { %3677 = vset.pattern.permute.xlu1 %v3712_v7 }
 0x23f   : > { %3041 = vperm.xlu1 %3677, %v2860_v59  }
 0x243   : > { %3678 = vset.pattern.permute.xlu1 %v3711_v6  ;;  %v4174_v6 = vand.u32 127, %v2861_v9 }
 0x244   : > { %3066 = vperm.xlu1 %3678, %v2859_v32  }
 0x263   : > { %v2921_v38 = vpop.permute.xlu1 %2920  ;;  %v2865_v60 = vpop.permute.xlu0 %2864 }
 0x264   : > { %vm2875_vm15 = vcmp.eq.s32.totalorder %v2865_v60, %v4174_v6  ;;  %vm2931_vm0 = vcmp.eq.s32.totalorder %v2921_v38, %v4174_v6 }
 0x265   : > { %v3175_v13 = vsel %vm2875_vm15, 1.0, %v3703_v2  ;;  %v3183_v24 = vsel %vm2931_vm0, 1.0, %v3703_v2 }
 0x268   : > { %v2949_v25 = vpop.permute.xlu1 %2948  ;;  %v2893_v21 = vpop.permute.xlu0 %2892 }
 0x269   : > { %vm2903_vm14 = vcmp.eq.s32.totalorder %v2893_v21, %v4174_v6  ;;  %vm2959_vm4 = vcmp.eq.s32.totalorder %v2949_v25, %v4174_v6 }
 0x26a   : > { %v3179_v11 = vsel %vm2903_vm14, 1.0, %v3703_v2  ;;  %v3187_v36 = vsel %vm2959_vm4, 1.0, %v3703_v2 }
 0x26b   : > { %v2915_v20 = vadd.f32 %v3179_v11, %v3175_v13 }
 0x26d   : > { %v4164_v16 = vpop.permute.xlu1 %3004  ;;  %v2977_v61 = vpop.permute.xlu0 %2976  ;;  %v2943_v27 = vadd.f32 %v3183_v24, %v2915_v20 }
 0x26e   : > { %vm2987_vm7 = vcmp.eq.s32.totalorder %v2977_v61, %v4174_v6  ;;  %vm3015_vm12 = vcmp.eq.s32.totalorder %v4164_v16, %v4174_v6 }
 0x26f   : > { %v2971_v12 = vadd.f32 %v3187_v36, %v2943_v27  ;;  %v3191_v14 = vsel %vm2987_vm7, 1.0, %v3703_v2  ;;  %v3195_v32 = vsel %vm3015_vm12, 1.0, %v3703_v2 }
 0x271   : > { %v2999_v47 = vadd.f32 %v3191_v14, %v2971_v12 }
 0x272   : > { %v4166_v19 = vpop.permute.xlu1 %3060  ;;  %v4170_v62 = vpop.permute.xlu0 %3032 }
 0x273   : > { %v3027_v54 = vadd.f32 %v3195_v32, %v2999_v47 }
 0x277   : > { %v2896_v18 = vpop.permute.xlu1 %2895  ;;  %v2868_v35 = vpop.permute.xlu0 %2867 }
 0x278   : > { %vm2904_vm1 = vcmp.eq.s32.totalorder %v2896_v18, %v4174_v6  ;;  %vm2876_vm2 = vcmp.eq.s32.totalorder %v2868_v35, %v4174_v6 }
 0x279   : > { %v3180_v3 = vsel %vm2904_vm1, 1.0, %v3703_v2  ;;  %v3176_v26 = vsel %vm2876_vm2, 1.0, %v3703_v2  ;;  %vm3043_vm1 = vcmp.eq.s32.totalorder %v4170_v62, %v4174_v6 }
 0x27a   : > { %v2916_v46 = vadd.f32 %v3180_v3, %v3176_v26  ;;  %v3199_v59 = vsel %vm3043_vm1, 1.0, %v3703_v2 }
 0x27b   : > { %v3055_v62 = vadd.f32 %v3199_v59, %v3027_v54 }
 0x27c   : > { %v2980_v42 = vpop.permute.xlu1 %2979  ;;  %v2924_v41 = vpop.permute.xlu0 %2923 }
 0x27d   : > { %vm2932_vm3 = vcmp.eq.s32.totalorder %v2924_v41, %v4174_v6  ;;  %vm2988_vm11 = vcmp.eq.s32.totalorder %v2980_v42, %v4174_v6 }
 0x27e   : > { %v3184_v28 = vsel %vm2932_vm3, 1.0, %v3703_v2  ;;  %v3192_v48 = vsel %vm2988_vm11, 1.0, %v3703_v2 }
 0x27f   : > { %v2944_v15 = vadd.f32 %v3184_v28, %v2916_v46 }
 0x281   : > { %v4168_v45 = vpop.permute.xlu1 %3035  ;;  %v2952_v4 = vpop.permute.xlu0 %2951 }
 0x282   : > { %vm2960_vm5 = vcmp.eq.s32.totalorder %v2952_v4, %v4174_v6 }
 0x283   : > { %v3188_v39 = vsel %vm2960_vm5, 1.0, %v3703_v2 }
 0x284   : > { %v2972_v17 = vadd.f32 %v3188_v39, %v2944_v15 }
 0x286   : > { %v3008_v7 = vpop.permute.xlu0 %3007  ;;  %v3000_v50 = vadd.f32 %v3192_v48, %v2972_v17 }
 0x287   : > { %vm3016_vm14 = vcmp.eq.s32.totalorder %v3008_v7, %v4174_v6 }
 0x288   : > { %v2871_v63 = vpop.permute.xlu1 %2870  ;;  %v3196_v52 = vsel %vm3016_vm14, 1.0, %v3703_v2 }
 0x289   : > { %vm2877_vm8 = vcmp.eq.s32.totalorder %v2871_v63, %v4174_v6  ;;  %v3028_v25 = vadd.f32 %v3196_v52, %v3000_v50 }
 0x28a   : > { %v3177_v33 = vsel %vm2877_vm8, 1.0, %v3703_v2 }
 0x28b   : > { %v2983_v22 = vpop.permute.xlu0 %2982 }
 0x28c   : > { %vm2989_vm2 = vcmp.eq.s32.totalorder %v2983_v22, %v4174_v6 }
 0x28d   : > { %v2899_v0 = vpop.permute.xlu1 %2898  ;;  %v3193_v16 = vsel %vm2989_vm2, 1.0, %v3703_v2 }
 0x28e   : > { %vm2905_vm6 = vcmp.eq.s32.totalorder %v2899_v0, %v4174_v6 }
 0x28f   : > { %v3181_v40 = vsel %vm2905_vm6, 1.0, %v3703_v2  ;;  %vm3044_vm6 = vcmp.eq.s32.totalorder %v4168_v45, %v4174_v6 }
 0x290   : > { %v4192_v29 = vpop.permute.xlu0 %3038  ;;  %v2917_v37 = vadd.f32 %v3181_v40, %v3177_v33  ;;  %v3200_v35 = vsel %vm3044_vm6, 1.0, %v3703_v2  ;;  %v3101_v40 = vld [vmem:[%s4159_s28] sm:$0x1] }
 0x291   : > { %vm3045_vm11 = vcmp.eq.s32.totalorder %v4192_v29, %v4174_v6 }
 0x292   : > { %v2927_v1 = vpop.permute.xlu1 %2926  ;;  %v3201_v13 = vsel %vm3045_vm11, 1.0, %v3703_v2 }
 0x293   : > { %vm2933_vm9 = vcmp.eq.s32.totalorder %v2927_v1, %v4174_v6 }
 0x294   : > { %v3185_v34 = vsel %vm2933_vm9, 1.0, %v3703_v2  ;;  %vm3071_vm9 = vcmp.eq.s32.totalorder %v4166_v19, %v4174_v6 }
 0x295   : > { %v2902_v43 = vpop.permute.xlu0 %2901  ;;  %v2945_v49 = vadd.f32 %v3185_v34, %v2917_v37 }
 0x296   : > { %vm2906_vm15 = vcmp.eq.s32.totalorder %v2902_v43, %v4174_v6 }
 0x297   : > { %v2955_v8 = vpop.permute.xlu1 %2954  ;;  %v3182_v55 = vsel %vm2906_vm15, 1.0, %v3703_v2 }
 0x298   : > { %vm2961_vm10 = vcmp.eq.s32.totalorder %v2955_v8, %v4174_v6  ;;  %v3056_v8 = vadd.f32 %v3200_v35, %v3028_v25 }
 0x299   : > { %v3189_v30 = vsel %vm2961_vm10, 1.0, %v3703_v2 }
 0x29a   : > { %v2973_v53 = vadd.f32 %v3189_v30, %v2945_v49  ;;  %v3064_v56 = vpop.permute.xlu0 %3063 }
 0x29b   : > { %vm3072_vm7 = vcmp.eq.s32.totalorder %v3064_v56, %v4174_v6 }
 0x29c   : > { %v4172_v5 = vpop.permute.xlu1 %3010  ;;  %v3001_v18 = vadd.f32 %v3193_v16, %v2973_v53  ;;  %v3204_v0 = vsel %vm3072_vm7, 1.0, %v3703_v2 }
 0x29d   : > { %vm3017_vm4 = vcmp.eq.s32.totalorder %v4172_v5, %v4174_v6  ;;  %v3203_v5 = vsel %vm3071_vm9, 1.0, %v3703_v2  ;;  %v3084_v7 = vadd.f32 %v3204_v0, %v3056_v8 }
 0x29e   : > { %v3197_v42 = vsel %vm3017_vm4, 1.0, %v3703_v2  ;;  %v3070_v4 = vpop.permute.xlu0 %3069  ;;  %v3083_v11 = vadd.f32 %v3203_v5, %v3055_v62 }
 0x29f   : > { %v3029_v41 = vadd.f32 %v3197_v42, %v3001_v18  ;;  %vm3074_vm12 = vcmp.eq.s32.totalorder %v3070_v4, %v4174_v6 }
 0x2a0   : > { %v3087_v3 = vadd.f32 %v3084_v7, %v3083_v11  ;;  %v3206_v27 = vsel %vm3074_vm12, 1.0, %v3703_v2 }
 0x2a1   : > { %v2874_v10 = vpop.permute.xlu1 %2873 }
 0x2a2   : > { %vm2878_vm13 = vcmp.eq.s32.totalorder %v2874_v10, %v4174_v6 }
 0x2a3   : > { %v3178_v51 = vsel %vm2878_vm13, 1.0, %v3703_v2 }
 0x2a4   : > { %v2918_v38 = vadd.f32 %v3182_v55, %v3178_v51 }
 0x2a6   : > { %v2930_v23 = vpop.permute.xlu1 %2929 }
 0x2a7   : > { %vm2934_vm0 = vcmp.eq.s32.totalorder %v2930_v23, %v4174_v6  ;;  %v3057_v23 = vadd.f32 %v3201_v13, %v3029_v41 }
 0x2a8   : > { %v3186_v57 = vsel %vm2934_vm0, 1.0, %v3703_v2 }
 0x2a9   : > { %v2946_v21 = vadd.f32 %v3186_v57, %v2918_v38 }
 0x2ab   : > { %v2958_v31 = vpop.permute.xlu1 %2957 }
 0x2ac   : > { %vm2962_vm3 = vcmp.eq.s32.totalorder %v2958_v31, %v4174_v6 }
 0x2ad   : > { %v3190_v60 = vsel %vm2962_vm3, 1.0, %v3703_v2 }
 0x2ae   : > { %v2974_v45 = vadd.f32 %v3190_v60, %v2946_v21 }
 0x2b0   : > { %v2986_v44 = vpop.permute.xlu1 %2985 }
 0x2b1   : > { %vm2990_vm5 = vcmp.eq.s32.totalorder %v2986_v44, %v4174_v6 }
 0x2b2   : > { %v3194_v61 = vsel %vm2990_vm5, 1.0, %v3703_v2 }
 0x2b3   : > { %v3002_v9 = vadd.f32 %v3194_v61, %v2974_v45 }
 0x2b5   : > { %v3014_v58 = vpop.permute.xlu1 %3013 }
 0x2b6   : > { %vm3018_vm8 = vcmp.eq.s32.totalorder %v3014_v58, %v4174_v6 }
 0x2b7   : > { %v3198_v1 = vsel %vm3018_vm8, 1.0, %v3703_v2 }
 0x2b8   : > { %v3030_v10 = vadd.f32 %v3198_v1, %v3002_v9 }
 0x2ba   : > { %v3042_v63 = vpop.permute.xlu1 %3041 }
 0x2bb   : > { %vm3046_vm10 = vcmp.eq.s32.totalorder %v3042_v63, %v4174_v6 }
 0x2bc   : > { %v3202_v19 = vsel %vm3046_vm10, 1.0, %v3703_v2 }
 0x2bd   : > { %v3058_v22 = vadd.f32 %v3202_v19, %v3030_v10 }
 0x2bf   : > { %v3067_v20 = vpop.permute.xlu1 %3066  ;;  %v3086_v28 = vadd.f32 %v3206_v27, %v3058_v22 }
 0x2c0   : > { %vm3073_vm13 = vcmp.eq.s32.totalorder %v3067_v20, %v4174_v6 }
 0x2c1   : > { %v3205_v24 = vsel %vm3073_vm13, 1.0, %v3703_v2 }
 0x2c2   : > { %v3085_v26 = vadd.f32 %v3205_v24, %v3057_v23 }
 0x2c4   : > { %v3088_v46 = vadd.f32 %v3087_v3, %v3085_v26 }
 0x2c6   : > { %v3089_v29 = vadd.f32 %v3088_v46, %v3086_v28 }
 0x2c8   : > { %v3090_v31 = vrot.slane %v3089_v29, 4 }
 0x2ca   : > { %v3091_v36 = vadd.f32 %v3090_v31, %v3089_v29 }
 0x2cc   : > { %v3092_v39 = vrot.slane %v3091_v36, 2 }
 0x2ce   : > { %v3093_v12 = vadd.f32 %v3092_v39, %v3091_v36 }
 0x2d0   : > { %v3094_v15 = vrot.slane %v3093_v12, 1 }
 0x2d2   : > { %v3095_v14 = vadd.f32 %v3094_v15, %v3093_v12 }
 0x2d4   : > { %v3102_v17 = vadd.f32 %v3101_v40, %v3095_v14 }
 0x2d6   : > { %3103 = vst [vmem:[%s4159_s28] sm:$0x1] %v3102_v17 }
 0x2d7 PF: > { %s13_s14 = sadd.s32 1, %s3701_s14   ;;  %s4263_s12 = smov %s3697_s13 }
 0x2d8   : > { %p10_p5 = scmp.ge.s32.totalorder %s13_s14, 6   ;;  %s4264_s13 = smov %s4266_s15 }
 0x2da   :  { %12 = sbr.rel (!%p10_p5) target bundleno = 2 (0x2), region = 66 }

</bundles_post_ra>
